<compile_context>
chip_gen: v6e
topology: v6e:2x2x1
jax: 0.10.0
libtpu: 0.0.40
codegen_flags: <defaults>
</compile_context>

<pallas_src>
import functools

import jax
import jax.numpy as jnp
from jax.experimental import pallas as pl
from jax.experimental.pallas import tpu as pltpu

NEG_SLOPE = 0.01  # torch leaky_relu default


def _leaky(x):
    return jnp.where(x > 0, x, NEG_SLOPE * x)


# ----------------------------------------------------------------------------
# Single fused kernel: prepare_input + InputMPNN + CGLayers + OutputMLP
# ----------------------------------------------------------------------------
def _fused_kernel(oh_ref, chc_ref, chr_ref, pos_ref, post_ref,
                  midc_ref, midr_ref, pool_ref,
                  w0_ref, wl_ref, wcg_ref, w1_ref, b1_ref, w2_ref, b2_ref,
                  out_ref, *, charge_power, charge_scale, num_mpnn_layers,
                  soft_cut_rad, soft_cut_width, hard_cut_rad,
                  num_cg_layers, max_l):
    f32 = jnp.float32
    X, S = oh_ref.shape                    # X = Bblk * N_pad (flattened atoms)
    Cin, C = w0_ref.shape
    H = b1_ref.shape[1]

    oh = oh_ref[...]                       # (X, S)
    chc = chc_ref[...]                     # (X, 1)
    chr_ = chr_ref[...]                    # (1, X)
    pos = pos_ref[...]                     # (X, 3)
    post = post_ref[...]                   # (3, X)

    # ---- prepare_input: powers of normalized charge (0**0 == 1) -------------
    cnorm = chc * (1.0 / charge_scale)
    pows = [jnp.ones_like(cnorm)]
    for _ in range(charge_power):
        pows.append(pows[-1] * cnorm)
    cpow = jnp.concatenate(pows, axis=-1)                       # (X, P+1)
    # species-major, power-minor layout via one broadcast outer product
    scal = (oh[:, :, None] * cpow[:, None, :]).reshape(X, Cin)  # (X, Cin)

    # ---- masks (atom, same-molecule block, edge) ----------------------------
    am = (chc > 0).astype(f32)                                  # (X, 1)
    amr = (chr_ > 0).astype(f32)                                # (1, X)
    block = (midc_ref[...] == midr_ref[...]).astype(f32)        # (X, X)
    emask = am * amr * block

    # ---- pairwise geometry: lane-dense (X, X) maps, no (N,N,3) tensor -------
    relc = [pos[:, d:d + 1] - post[d:d + 1, :] for d in range(3)]
    norms = jnp.sqrt(relc[0] * relc[0] + relc[1] * relc[1]
                     + relc[2] * relc[2])                       # (X, X)
    hard = (norms < hard_cut_rad).astype(f32) * emask
    w_edge = jax.nn.sigmoid((soft_cut_rad - norms)
                            * (1.0 / soft_cut_width)) * hard

    # ---- InputMPNN: one (X,X)@(X,C) matmul per layer -------------------------
    agg = jnp.dot(w_edge, scal, preferred_element_type=f32)     # (X, Cin)
    feat = _leaky(jnp.dot(agg, w0_ref[...], preferred_element_type=f32))
    for l in range(num_mpnn_layers - 1):
        agg = jnp.dot(w_edge, feat, preferred_element_type=f32)
        feat = _leaky(jnp.dot(agg, wl_ref[l], preferred_element_type=f32))
    feat = feat * am                                            # (X, C)

    # ---- CGLayers (rotation-invariant scalars) fused with OutputMLP layer 1 --
    # TODO(synk): exact Clebsch-Gordan tensor products / l>=2 real spherical
    # harmonics not reproduced (CGLayers source unavailable); uses l<=1
    # harmonics + channel-gram invariants with the exact num_scalars layout,
    # and the l=1 kernels drop the (r/(r+eps)) ~= 1 factor.
    radial = jnp.exp(-norms) * hard                  # loop-invariant, hoisted
    dirk = [radial * relc[d] for d in range(3)]      # l=1 kernels, hoisted

    W1 = w1_ref[...]                                            # (NS, H)
    h_acc = jnp.zeros((X, H), f32) + b1_ref[...]                # start from bias
    off = 0
    for k in range(num_cg_layers):
        feat = _leaky(jnp.dot(feat, wcg_ref[k], preferred_element_type=f32))
        r0 = jnp.dot(radial, feat, preferred_element_type=f32)  # l=0 aggregate
        g0 = (r0[:, :, None] * r0[:, None, :]).reshape(X, C * C)
        pieces = [feat, r0, g0]
        if max_l >= 1:
            g1 = None
            for d in range(3):                    # one (X,C,C) outer at a time
                r1 = jnp.dot(dirk[d], feat, preferred_element_type=f32)
                o = r1[:, :, None] * r1[:, None, :]
                g1 = o if g1 is None else g1 + o
            pieces.append(g1.reshape(X, C * C))
        slab = jnp.concatenate(pieces, axis=-1)                 # (X, 2C+2C^2)
        width = slab.shape[1]
        # Single MXU push per CG layer against the contiguous W1 slab.
        h_acc = h_acc + jnp.dot(slab, W1[off:off + width, :],
                                preferred_element_type=f32)
        # TODO(synk): l>=2 invariant slots are identically zero -> skipped.
        off += 2 * C + (max_l + 1) * C * C
    assert off == W1.shape[0]   # trace-time: consumed exactly num_scalars rows

    # ---- OutputMLP layer 2 + atom mask + per-molecule pooling matmul --------
    h = _leaky(h_acc)
    e = (jnp.dot(h, w2_ref[...], preferred_element_type=f32) + b2_ref[...]) * am
    out_ref[...] = jnp.dot(pool_ref[...], e, preferred_element_type=f32)


# ----------------------------------------------------------------------------
# FullModel wrapper
# ----------------------------------------------------------------------------
class FullModelPallas:
    def __init__(self, max_l, max_sh, num_cg_layers, num_channels, num_species,
                 cutoff_type, hard_cut_rad, soft_cut_rad, soft_cut_width,
                 weight_init, level_gain, charge_power, basis_set, charge_scale,
                 gaussian_mask, top, input, num_mpnn_layers,
                 activation='leakyrelu', key=None, hidden=32):
        del max_sh, cutoff_type, weight_init, level_gain, basis_set
        del gaussian_mask, top, input, activation
        self.charge_power = int(charge_power)
        self.charge_scale = float(charge_scale)
        self.num_species = int(num_species)
        self.max_l = int(max_l[0])
        self.num_channels = int(num_channels[0])
        self.num_cg_layers = int(num_cg_layers)
        self.num_mpnn_layers = int(num_mpnn_layers)
        self.hard_cut_rad = float(hard_cut_rad)
        self.soft_cut_rad = float(soft_cut_rad)
        self.soft_cut_width = float(soft_cut_width)
        self.num_scalars = self.get_num_scalars()
        self.hidden = int(hidden)

        Cin = self.num_species * (self.charge_power + 1)
        C = self.num_channels
        if key is None:
            key = jax.random.PRNGKey(0)
        ks = jax.random.split(key, 5)
        nl_extra = max(self.num_mpnn_layers - 1, 1)
        self.w0 = (jax.random.normal(ks[0], (Cin, C), jnp.float32)
                   / jnp.sqrt(jnp.float32(Cin)))
        self.wl = (jax.random.normal(ks[1], (nl_extra, C, C), jnp.float32)
                   / jnp.sqrt(jnp.float32(C)))
        self.wcg = (jax.random.normal(ks[2], (self.num_cg_layers, C, C),
                                      jnp.float32) / jnp.sqrt(jnp.float32(C)))
        self.w1 = (jax.random.normal(ks[3], (self.num_scalars, self.hidden),
                                     jnp.float32)
                   / jnp.sqrt(jnp.float32(self.num_scalars)))
        self.b1 = jnp.zeros((1, self.hidden), jnp.float32)
        self.w2 = (jax.random.normal(ks[4], (self.hidden, 1), jnp.float32)
                   / jnp.sqrt(jnp.float32(self.hidden)))
        self.b2 = jnp.zeros((1, 1), jnp.float32)

    def get_num_scalars(self):
        return self.num_cg_layers * (2 * self.num_channels
                                     + (self.max_l + 1) * self.num_channels ** 2)

    def __call__(self, data):
        positions = jnp.asarray(data['positions'], jnp.float32)   # (B, N, 3)
        one_hot = jnp.asarray(data['one_hot'], jnp.float32)       # (B, N, S)
        charges = jnp.asarray(data['charges'], jnp.float32)       # (B, N)
        B, N, S = one_hot.shape
        Cin = S * (self.charge_power + 1)
        C = self.num_channels
        NS = self.num_scalars
        H = self.hidden
        nl_extra = self.wl.shape[0]
        ncg = self.num_cg_layers

        # Pad N to a sublane multiple (padded atoms have charge 0 -> masked).
        Np = -(-N // 8) * 8
        if Np != N:
            positions = jnp.pad(positions, ((0, 0), (0, Np - N), (0, 0)))
            one_hot = jnp.pad(one_hot, ((0, 0), (0, Np - N), (0, 0)))
            charges = jnp.pad(charges, ((0, 0), (0, Np - N)))

        # Batch block: target X = Bblk*Np ~ 128-256 MXU rows, but keep >= 2
        # grid steps when possible so both v7x TensorCores get a "parallel"
        # slice of the batch axis.  Padded molecules predict exactly 0.
        target_x, min_x = 256, 128
        bblk = max(1, min(B, max(1, target_x // Np)))
        nt = -(-B // bblk)
        if nt == 1 and B > 1:
            half = -(-B // 2)
            if half * Np >= min_x or B * Np < min_x:
                bblk = half
                nt = -(-B // bblk)
        Bpad = nt * bblk
        if Bpad != B:
            pad = Bpad - B
            positions = jnp.pad(positions, ((0, pad), (0, 0), (0, 0)))
            one_hot = jnp.pad(one_hot, ((0, pad), (0, 0), (0, 0)))
            charges = jnp.pad(charges, ((0, pad), (0, 0)))
        X = bblk * Np

        # Per-tile flattened layouts (leading grid axis -> blocks equal full
        # trailing dims, no (8,128) divisibility hazards, free reshapes).
        oh_t = one_hot.reshape(nt, X, S)
        chc = charges.reshape(nt, X, 1)
        chr_ = charges.reshape(nt, 1, X)
        pos_t = positions.reshape(nt, X, 3)
        post = jnp.swapaxes(pos_t, 1, 2)                        # (nt, 3, X)
        mol = jnp.repeat(jnp.arange(Bpad, dtype=jnp.float32), Np)
        midc = mol.reshape(nt, X, 1)
        midr = mol.reshape(nt, 1, X)
        pool = (jnp.arange(X) // Np
                == jnp.arange(bblk)[:, None]).astype(jnp.float32)  # (bblk, X)

        kernel = functools.partial(
            _fused_kernel, charge_power=self.charge_power,
            charge_scale=self.charge_scale,
            num_mpnn_layers=self.num_mpnn_layers,
            soft_cut_rad=self.soft_cut_rad,
            soft_cut_width=self.soft_cut_width,
            hard_cut_rad=self.hard_cut_rad,
            num_cg_layers=ncg, max_l=self.max_l)

        # Explicit scoped-VMEM budget (v7x has only 64 MiB physical VMEM).
        vmem_limit = int(min(64 * 1024 * 1024,
                             max(32 * 1024 * 1024, 16 * X * X * 4)))

        fused = pl.pallas_call(
            kernel,
            grid=(nt,),
            in_specs=[
                pl.BlockSpec((None, X, S), lambda t: (t, 0, 0)),
                pl.BlockSpec((None, X, 1), lambda t: (t, 0, 0)),
                pl.BlockSpec((None, 1, X), lambda t: (t, 0, 0)),
                pl.BlockSpec((None, X, 3), lambda t: (t, 0, 0)),
                pl.BlockSpec((None, 3, X), lambda t: (t, 0, 0)),
                pl.BlockSpec((None, X, 1), lambda t: (t, 0, 0)),
                pl.BlockSpec((None, 1, X), lambda t: (t, 0, 0)),
                pl.BlockSpec((bblk, X), lambda t: (0, 0)),
                pl.BlockSpec((Cin, C), lambda t: (0, 0)),
                pl.BlockSpec((nl_extra, C, C), lambda t: (0, 0, 0)),
                pl.BlockSpec((ncg, C, C), lambda t: (0, 0, 0)),
                pl.BlockSpec((NS, H), lambda t: (0, 0)),
                pl.BlockSpec((1, H), lambda t: (0, 0)),
                pl.BlockSpec((H, 1), lambda t: (0, 0)),
                pl.BlockSpec((1, 1), lambda t: (0, 0)),
            ],
            out_specs=pl.BlockSpec((None, bblk, 1), lambda t: (t, 0, 0)),
            out_shape=jax.ShapeDtypeStruct((nt, bblk, 1), jnp.float32),
            compiler_params=pltpu.CompilerParams(
                dimension_semantics=("parallel",),
                vmem_limit_bytes=vmem_limit),
        )
        pred = fused(oh_t, chc, chr_, pos_t, post, midc, midr, pool,
                     self.w0, self.wl, self.wcg, self.w1, self.b1,
                     self.w2, self.b2)
        # TODO(synk): datetime/logging timing side effects of the reference
        # forward() are intentionally omitted.
        return pred.reshape(Bpad)[:B]                              # (B,)


if __name__ == "__main__":
    key = jax.random.PRNGKey(0)
    B, N = 2, 8
    num_species = 4
    charge_power = 2
    charge_scale = 9.0

    k1, k2, k3 = jax.random.split(key, 3)
    # species index 0 == padding atom (charge 0) -> exercises atom/edge masks
    species = jax.random.randint(k1, (B, N), 0, num_species + 1)
    one_hot = jax.nn.one_hot(species - 1, num_species, dtype=jnp.float32)
    charges = species.astype(jnp.float32)                        # (B, N)
    positions = 2.0 * jax.random.normal(k2, (B, N, 3), dtype=jnp.float32)

    model = FullModelPallas(
        max_l=[1], max_sh=[1], num_cg_layers=2, num_channels=[4],
        num_species=num_species, cutoff_type=['learn'], hard_cut_rad=10.0,
        soft_cut_rad=5.0, soft_cut_width=1.0, weight_init='rand',
        level_gain=[1.0], charge_power=charge_power, basis_set=(3, 3),
        charge_scale=charge_scale, gaussian_mask=False, top='linear',
        input='linear', num_mpnn_layers=2, key=k3)

    data = {"positions": positions, "one_hot": one_hot, "charges": charges}
    prediction = model(data)
    jax.block_until_ready(prediction)
    assert prediction.shape == (B,)
    assert bool(jnp.all(jnp.isfinite(prediction)))
    print("KERNEL_OK")
</pallas_src>

<mosaic_0001>
module attributes {stable_mosaic.version = 11 : i64} {
  func.func @_fused_kernel(%arg0: i32, %arg1: memref<1x8x4xf32, #tpu.memory_space<vmem>>, %arg2: memref<1x8x1xf32, #tpu.memory_space<vmem>>, %arg3: memref<1x1x8xf32, #tpu.memory_space<vmem>>, %arg4: memref<1x8x3xf32, #tpu.memory_space<vmem>>, %arg5: memref<1x3x8xf32, #tpu.memory_space<vmem>>, %arg6: memref<1x8x1xf32, #tpu.memory_space<vmem>>, %arg7: memref<1x1x8xf32, #tpu.memory_space<vmem>>, %arg8: memref<1x8xf32, #tpu.memory_space<vmem>>, %arg9: memref<12x4xf32, #tpu.memory_space<vmem>>, %arg10: memref<1x4x4xf32, #tpu.memory_space<vmem>>, %arg11: memref<2x4x4xf32, #tpu.memory_space<vmem>>, %arg12: memref<80x32xf32, #tpu.memory_space<vmem>>, %arg13: memref<1x32xf32, #tpu.memory_space<vmem>>, %arg14: memref<32x1xf32, #tpu.memory_space<vmem>>, %arg15: memref<1x1xf32, #tpu.memory_space<vmem>>, %arg16: memref<1x1x1xf32, #tpu.memory_space<vmem>>) attributes {dimension_semantics = [#tpu.dimension_semantics<parallel>], iteration_bounds = array<i64: 2>, scalar_prefetch = 0 : i64, scratch_operands = 0 : i64, tpu.core_type = #tpu.core_type<tc>, window_params = [{transform_indices = @transform_0, window_bounds = array<i64: 1, 8, 4>}, {transform_indices = @transform_1, window_bounds = array<i64: 1, 8, 1>}, {transform_indices = @transform_2, window_bounds = array<i64: 1, 1, 8>}, {transform_indices = @transform_3, window_bounds = array<i64: 1, 8, 3>}, {transform_indices = @transform_4, window_bounds = array<i64: 1, 3, 8>}, {transform_indices = @transform_5, window_bounds = array<i64: 1, 8, 1>}, {transform_indices = @transform_6, window_bounds = array<i64: 1, 1, 8>}, {pipeline_mode = #tpu.pipeline_mode<synchronous>, transform_indices = @transform_7, window_bounds = array<i64: 1, 8>}, {pipeline_mode = #tpu.pipeline_mode<synchronous>, transform_indices = @transform_8, window_bounds = array<i64: 12, 4>}, {pipeline_mode = #tpu.pipeline_mode<synchronous>, transform_indices = @transform_9, window_bounds = array<i64: 1, 4, 4>}, {pipeline_mode = #tpu.pipeline_mode<synchronous>, transform_indices = @transform_10, window_bounds = array<i64: 2, 4, 4>}, {pipeline_mode = #tpu.pipeline_mode<synchronous>, transform_indices = @transform_11, window_bounds = array<i64: 80, 32>}, {pipeline_mode = #tpu.pipeline_mode<synchronous>, transform_indices = @transform_12, window_bounds = array<i64: 1, 32>}, {pipeline_mode = #tpu.pipeline_mode<synchronous>, transform_indices = @transform_13, window_bounds = array<i64: 32, 1>}, {pipeline_mode = #tpu.pipeline_mode<synchronous>, transform_indices = @transform_14, window_bounds = array<i64: 1, 1>}, {transform_indices = @transform_15, window_bounds = array<i64: 1, 1, 1>}]} {
    %c0 = arith.constant 0 : index
    %c0_0 = arith.constant 0 : index
    %c0_1 = arith.constant 0 : index
    %0 = vector.load %arg1[%c0, %c0_0, %c0_1] : memref<1x8x4xf32, #tpu.memory_space<vmem>>, vector<1x8x4xf32>
    %1 = vector.shape_cast %0 : vector<1x8x4xf32> to vector<8x4xf32>
    %c0_2 = arith.constant 0 : index
    %c0_3 = arith.constant 0 : index
    %c0_4 = arith.constant 0 : index
    %2 = vector.load %arg2[%c0_2, %c0_3, %c0_4] : memref<1x8x1xf32, #tpu.memory_space<vmem>>, vector<1x8x1xf32>
    %3 = vector.shape_cast %2 : vector<1x8x1xf32> to vector<8x1xf32>
    %c0_5 = arith.constant 0 : index
    %c0_6 = arith.constant 0 : index
    %c0_7 = arith.constant 0 : index
    %4 = vector.load %arg3[%c0_5, %c0_6, %c0_7] : memref<1x1x8xf32, #tpu.memory_space<vmem>>, vector<1x1x8xf32>
    %5 = vector.shape_cast %4 : vector<1x1x8xf32> to vector<1x8xf32>
    %c0_8 = arith.constant 0 : index
    %c0_9 = arith.constant 0 : index
    %c0_10 = arith.constant 0 : index
    %6 = vector.load %arg4[%c0_8, %c0_9, %c0_10] : memref<1x8x3xf32, #tpu.memory_space<vmem>>, vector<1x8x3xf32>
    %7 = vector.shape_cast %6 : vector<1x8x3xf32> to vector<8x3xf32>
    %c0_11 = arith.constant 0 : index
    %c0_12 = arith.constant 0 : index
    %c0_13 = arith.constant 0 : index
    %8 = vector.load %arg5[%c0_11, %c0_12, %c0_13] : memref<1x3x8xf32, #tpu.memory_space<vmem>>, vector<1x3x8xf32>
    %9 = vector.shape_cast %8 : vector<1x3x8xf32> to vector<3x8xf32>
    %cst = arith.constant 0.111111112 : f32
    %10 = vector.broadcast %cst : f32 to vector<8x1xf32>
    %11 = arith.mulf %3, %10 : vector<8x1xf32>
    %cst_14 = arith.constant 1.000000e+00 : f32
    %12 = vector.broadcast %cst_14 : f32 to vector<8x1xf32>
    %13 = arith.mulf %12, %11 : vector<8x1xf32>
    %14 = arith.mulf %13, %11 : vector<8x1xf32>
    %15 = tpu.concatenate %12, %13, %14 in 1 : vector<8x1xf32>, vector<8x1xf32>, vector<8x1xf32> -> vector<8x3xf32>
    %16 = vector.shape_cast %1 : vector<8x4xf32> to vector<8x4x1xf32>
    %17 = vector.shape_cast %15 : vector<8x3xf32> to vector<8x1x3xf32>
    %18 = vector.broadcast %16 : vector<8x4x1xf32> to vector<8x4x3xf32>
    %19 = vector.broadcast %17 : vector<8x1x3xf32> to vector<8x4x3xf32>
    %20 = arith.mulf %18, %19 : vector<8x4x3xf32>
    %21 = vector.shape_cast %20 : vector<8x4x3xf32> to vector<8x12xf32>
    %cst_15 = arith.constant 0.000000e+00 : f32
    %22 = vector.broadcast %cst_15 : f32 to vector<8x1xf32>
    %23 = arith.cmpf ogt, %3, %22 : vector<8x1xf32>
    %24 = arith.extui %23 : vector<8x1xi1> to vector<8x1xi32>
    %25 = arith.sitofp %24 : vector<8x1xi32> to vector<8x1xf32>
    %cst_16 = arith.constant 0.000000e+00 : f32
    %26 = vector.broadcast %cst_16 : f32 to vector<1x8xf32>
    %27 = arith.cmpf ogt, %5, %26 : vector<1x8xf32>
    %28 = arith.extui %27 : vector<1x8xi1> to vector<1x8xi32>
    %29 = arith.sitofp %28 : vector<1x8xi32> to vector<1x8xf32>
    %c0_17 = arith.constant 0 : index
    %c0_18 = arith.constant 0 : index
    %c0_19 = arith.constant 0 : index
    %30 = vector.load %arg6[%c0_17, %c0_18, %c0_19] : memref<1x8x1xf32, #tpu.memory_space<vmem>>, vector<1x8x1xf32>
    %31 = vector.shape_cast %30 : vector<1x8x1xf32> to vector<8x1xf32>
    %c0_20 = arith.constant 0 : index
    %c0_21 = arith.constant 0 : index
    %c0_22 = arith.constant 0 : index
    %32 = vector.load %arg7[%c0_20, %c0_21, %c0_22] : memref<1x1x8xf32, #tpu.memory_space<vmem>>, vector<1x1x8xf32>
    %33 = vector.shape_cast %32 : vector<1x1x8xf32> to vector<1x8xf32>
    %34 = vector.broadcast %31 : vector<8x1xf32> to vector<8x8xf32>
    %35 = vector.broadcast %33 : vector<1x8xf32> to vector<8x8xf32>
    %36 = arith.cmpf oeq, %34, %35 : vector<8x8xf32>
    %37 = arith.extui %36 : vector<8x8xi1> to vector<8x8xi32>
    %38 = arith.sitofp %37 : vector<8x8xi32> to vector<8x8xf32>
    %39 = vector.broadcast %25 : vector<8x1xf32> to vector<8x8xf32>
    %40 = vector.broadcast %29 : vector<1x8xf32> to vector<8x8xf32>
    %41 = arith.mulf %39, %40 : vector<8x8xf32>
    %42 = arith.mulf %41, %38 : vector<8x8xf32>
    %43 = vector.extract_strided_slice %7 {offsets = [0, 0], sizes = [8, 1], strides = [1, 1]} : vector<8x3xf32> to vector<8x1xf32>
    %44 = vector.extract_strided_slice %9 {offsets = [0, 0], sizes = [1, 8], strides = [1, 1]} : vector<3x8xf32> to vector<1x8xf32>
    %45 = vector.broadcast %43 : vector<8x1xf32> to vector<8x8xf32>
    %46 = vector.broadcast %44 : vector<1x8xf32> to vector<8x8xf32>
    %47 = arith.subf %45, %46 : vector<8x8xf32>
    %48 = vector.extract_strided_slice %7 {offsets = [0, 1], sizes = [8, 1], strides = [1, 1]} : vector<8x3xf32> to vector<8x1xf32>
    %49 = vector.extract_strided_slice %9 {offsets = [1, 0], sizes = [1, 8], strides = [1, 1]} : vector<3x8xf32> to vector<1x8xf32>
    %50 = vector.broadcast %48 : vector<8x1xf32> to vector<8x8xf32>
    %51 = vector.broadcast %49 : vector<1x8xf32> to vector<8x8xf32>
    %52 = arith.subf %50, %51 : vector<8x8xf32>
    %53 = vector.extract_strided_slice %7 {offsets = [0, 2], sizes = [8, 1], strides = [1, 1]} : vector<8x3xf32> to vector<8x1xf32>
    %54 = vector.extract_strided_slice %9 {offsets = [2, 0], sizes = [1, 8], strides = [1, 1]} : vector<3x8xf32> to vector<1x8xf32>
    %55 = vector.broadcast %53 : vector<8x1xf32> to vector<8x8xf32>
    %56 = vector.broadcast %54 : vector<1x8xf32> to vector<8x8xf32>
    %57 = arith.subf %55, %56 : vector<8x8xf32>
    %58 = arith.mulf %47, %47 : vector<8x8xf32>
    %59 = arith.mulf %52, %52 : vector<8x8xf32>
    %60 = arith.addf %58, %59 : vector<8x8xf32>
    %61 = arith.mulf %57, %57 : vector<8x8xf32>
    %62 = arith.addf %60, %61 : vector<8x8xf32>
    %63 = math.sqrt %62 : vector<8x8xf32>
    %cst_23 = arith.constant 1.000000e+01 : f32
    %64 = vector.broadcast %cst_23 : f32 to vector<8x8xf32>
    %65 = arith.cmpf olt, %63, %64 : vector<8x8xf32>
    %66 = arith.extui %65 : vector<8x8xi1> to vector<8x8xi32>
    %67 = arith.sitofp %66 : vector<8x8xi32> to vector<8x8xf32>
    %68 = arith.mulf %67, %42 : vector<8x8xf32>
    %cst_24 = arith.constant 5.000000e+00 : f32
    %69 = vector.broadcast %cst_24 : f32 to vector<8x8xf32>
    %70 = arith.subf %69, %63 : vector<8x8xf32>
    %cst_25 = arith.constant 1.000000e+00 : f32
    %71 = vector.broadcast %cst_25 : f32 to vector<8x8xf32>
    %72 = arith.mulf %70, %71 : vector<8x8xf32>
    %73 = arith.negf %72 : vector<8x8xf32>
    %74 = math.exp %73 : vector<8x8xf32>
    %cst_26 = arith.constant 1.000000e+00 : f32
    %75 = vector.broadcast %cst_26 : f32 to vector<8x8xf32>
    %76 = arith.addf %75, %74 : vector<8x8xf32>
    %77 = arith.divf %75, %76 : vector<8x8xf32>
    %78 = arith.mulf %77, %68 : vector<8x8xf32>
    %cst_27 = arith.constant dense<0.000000e+00> : vector<8x12xf32>
    %79 = tpu.matmul %78, %21, %cst_27 {dimension_numbers = #tpu.dot_dimension_numbers<[1], [0], [0], [1], [0, 0, 1, 1], [], []>} : vector<8x8xf32>, vector<8x12xf32>, vector<8x12xf32> -> vector<8x12xf32>
    %c0_28 = arith.constant 0 : index
    %c0_29 = arith.constant 0 : index
    %80 = vector.load %arg9[%c0_28, %c0_29] : memref<12x4xf32, #tpu.memory_space<vmem>>, vector<12x4xf32>
    %cst_30 = arith.constant dense<0.000000e+00> : vector<8x4xf32>
    %81 = tpu.matmul %79, %80, %cst_30 {dimension_numbers = #tpu.dot_dimension_numbers<[1], [0], [0], [1], [0, 0, 1, 1], [], []>} : vector<8x12xf32>, vector<12x4xf32>, vector<8x4xf32> -> vector<8x4xf32>
    %cst_31 = arith.constant 0.000000e+00 : f32
    %82 = vector.broadcast %cst_31 : f32 to vector<8x4xf32>
    %83 = arith.cmpf ogt, %81, %82 : vector<8x4xf32>
    %cst_32 = arith.constant 0.00999999977 : f32
    %84 = vector.broadcast %cst_32 : f32 to vector<8x4xf32>
    %85 = arith.mulf %84, %81 : vector<8x4xf32>
    %86 = arith.select %83, %81, %85 : vector<8x4xi1>, vector<8x4xf32>
    %cst_33 = arith.constant dense<0.000000e+00> : vector<8x4xf32>
    %87 = tpu.matmul %78, %86, %cst_33 {dimension_numbers = #tpu.dot_dimension_numbers<[1], [0], [0], [1], [0, 0, 1, 1], [], []>} : vector<8x8xf32>, vector<8x4xf32>, vector<8x4xf32> -> vector<8x4xf32>
    %c0_34 = arith.constant 0 : index
    %c0_35 = arith.constant 0 : index
    %c0_36 = arith.constant 0 : index
    %88 = vector.load %arg10[%c0_34, %c0_35, %c0_36] : memref<1x4x4xf32, #tpu.memory_space<vmem>>, vector<1x4x4xf32>
    %89 = vector.shape_cast %88 : vector<1x4x4xf32> to vector<4x4xf32>
    %cst_37 = arith.constant dense<0.000000e+00> : vector<8x4xf32>
    %90 = tpu.matmul %87, %89, %cst_37 {dimension_numbers = #tpu.dot_dimension_numbers<[1], [0], [0], [1], [0, 0, 1, 1], [], []>} : vector<8x4xf32>, vector<4x4xf32>, vector<8x4xf32> -> vector<8x4xf32>
    %cst_38 = arith.constant 0.000000e+00 : f32
    %91 = vector.broadcast %cst_38 : f32 to vector<8x4xf32>
    %92 = arith.cmpf ogt, %90, %91 : vector<8x4xf32>
    %cst_39 = arith.constant 0.00999999977 : f32
    %93 = vector.broadcast %cst_39 : f32 to vector<8x4xf32>
    %94 = arith.mulf %93, %90 : vector<8x4xf32>
    %95 = arith.select %92, %90, %94 : vector<8x4xi1>, vector<8x4xf32>
    %96 = vector.broadcast %25 : vector<8x1xf32> to vector<8x4xf32>
    %97 = arith.mulf %95, %96 : vector<8x4xf32>
    %cst_40 = arith.constant 0.000000e+00 : f32
    %98 = vector.broadcast %cst_40 : f32 to vector<8x8xf32>
    %99 = arith.subf %98, %63 : vector<8x8xf32>
    %100 = math.exp %99 : vector<8x8xf32>
    %101 = arith.mulf %100, %68 : vector<8x8xf32>
    %102 = arith.mulf %101, %47 : vector<8x8xf32>
    %103 = arith.mulf %101, %52 : vector<8x8xf32>
    %104 = arith.mulf %101, %57 : vector<8x8xf32>
    %c0_41 = arith.constant 0 : index
    %c0_42 = arith.constant 0 : index
    %105 = vector.load %arg12[%c0_41, %c0_42] : memref<80x32xf32, #tpu.memory_space<vmem>>, vector<80x32xf32>
    %cst_43 = arith.constant 0.000000e+00 : f32
    %106 = vector.broadcast %cst_43 : f32 to vector<8x32xf32>
    %c0_44 = arith.constant 0 : index
    %c0_45 = arith.constant 0 : index
    %107 = vector.load %arg13[%c0_44, %c0_45] : memref<1x32xf32, #tpu.memory_space<vmem>>, vector<1x32xf32>
    %108 = vector.broadcast %107 : vector<1x32xf32> to vector<8x32xf32>
    %109 = arith.addf %106, %108 : vector<8x32xf32>
    %c0_46 = arith.constant 0 : index
    %c0_47 = arith.constant 0 : index
    %c0_48 = arith.constant 0 : index
    %110 = vector.load %arg11[%c0_46, %c0_47, %c0_48] : memref<2x4x4xf32, #tpu.memory_space<vmem>>, vector<1x4x4xf32>
    %111 = vector.shape_cast %110 : vector<1x4x4xf32> to vector<4x4xf32>
    %cst_49 = arith.constant dense<0.000000e+00> : vector<8x4xf32>
    %112 = tpu.matmul %97, %111, %cst_49 {dimension_numbers = #tpu.dot_dimension_numbers<[1], [0], [0], [1], [0, 0, 1, 1], [], []>} : vector<8x4xf32>, vector<4x4xf32>, vector<8x4xf32> -> vector<8x4xf32>
    %cst_50 = arith.constant 0.000000e+00 : f32
    %113 = vector.broadcast %cst_50 : f32 to vector<8x4xf32>
    %114 = arith.cmpf ogt, %112, %113 : vector<8x4xf32>
    %cst_51 = arith.constant 0.00999999977 : f32
    %115 = vector.broadcast %cst_51 : f32 to vector<8x4xf32>
    %116 = arith.mulf %115, %112 : vector<8x4xf32>
    %117 = arith.select %114, %112, %116 : vector<8x4xi1>, vector<8x4xf32>
    %cst_52 = arith.constant dense<0.000000e+00> : vector<8x4xf32>
    %118 = tpu.matmul %101, %117, %cst_52 {dimension_numbers = #tpu.dot_dimension_numbers<[1], [0], [0], [1], [0, 0, 1, 1], [], []>} : vector<8x8xf32>, vector<8x4xf32>, vector<8x4xf32> -> vector<8x4xf32>
    %119 = vector.shape_cast %118 : vector<8x4xf32> to vector<8x4x1xf32>
    %120 = vector.shape_cast %118 : vector<8x4xf32> to vector<8x1x4xf32>
    %121 = vector.broadcast %119 : vector<8x4x1xf32> to vector<8x4x4xf32>
    %122 = vector.broadcast %120 : vector<8x1x4xf32> to vector<8x4x4xf32>
    %123 = arith.mulf %121, %122 : vector<8x4x4xf32>
    %124 = vector.shape_cast %123 : vector<8x4x4xf32> to vector<8x16xf32>
    %cst_53 = arith.constant dense<0.000000e+00> : vector<8x4xf32>
    %125 = tpu.matmul %102, %117, %cst_53 {dimension_numbers = #tpu.dot_dimension_numbers<[1], [0], [0], [1], [0, 0, 1, 1], [], []>} : vector<8x8xf32>, vector<8x4xf32>, vector<8x4xf32> -> vector<8x4xf32>
    %126 = vector.shape_cast %125 : vector<8x4xf32> to vector<8x4x1xf32>
    %127 = vector.shape_cast %125 : vector<8x4xf32> to vector<8x1x4xf32>
    %128 = vector.broadcast %126 : vector<8x4x1xf32> to vector<8x4x4xf32>
    %129 = vector.broadcast %127 : vector<8x1x4xf32> to vector<8x4x4xf32>
    %130 = arith.mulf %128, %129 : vector<8x4x4xf32>
    %cst_54 = arith.constant dense<0.000000e+00> : vector<8x4xf32>
    %131 = tpu.matmul %103, %117, %cst_54 {dimension_numbers = #tpu.dot_dimension_numbers<[1], [0], [0], [1], [0, 0, 1, 1], [], []>} : vector<8x8xf32>, vector<8x4xf32>, vector<8x4xf32> -> vector<8x4xf32>
    %132 = vector.shape_cast %131 : vector<8x4xf32> to vector<8x4x1xf32>
    %133 = vector.shape_cast %131 : vector<8x4xf32> to vector<8x1x4xf32>
    %134 = vector.broadcast %132 : vector<8x4x1xf32> to vector<8x4x4xf32>
    %135 = vector.broadcast %133 : vector<8x1x4xf32> to vector<8x4x4xf32>
    %136 = arith.mulf %134, %135 : vector<8x4x4xf32>
    %137 = arith.addf %130, %136 : vector<8x4x4xf32>
    %cst_55 = arith.constant dense<0.000000e+00> : vector<8x4xf32>
    %138 = tpu.matmul %104, %117, %cst_55 {dimension_numbers = #tpu.dot_dimension_numbers<[1], [0], [0], [1], [0, 0, 1, 1], [], []>} : vector<8x8xf32>, vector<8x4xf32>, vector<8x4xf32> -> vector<8x4xf32>
    %139 = vector.shape_cast %138 : vector<8x4xf32> to vector<8x4x1xf32>
    %140 = vector.shape_cast %138 : vector<8x4xf32> to vector<8x1x4xf32>
    %141 = vector.broadcast %139 : vector<8x4x1xf32> to vector<8x4x4xf32>
    %142 = vector.broadcast %140 : vector<8x1x4xf32> to vector<8x4x4xf32>
    %143 = arith.mulf %141, %142 : vector<8x4x4xf32>
    %144 = arith.addf %137, %143 : vector<8x4x4xf32>
    %145 = vector.shape_cast %144 : vector<8x4x4xf32> to vector<8x16xf32>
    %146 = tpu.concatenate %117, %118, %124, %145 in 1 : vector<8x4xf32>, vector<8x4xf32>, vector<8x16xf32>, vector<8x16xf32> -> vector<8x40xf32>
    %147 = vector.extract_strided_slice %105 {offsets = [0, 0], sizes = [40, 32], strides = [1, 1]} : vector<80x32xf32> to vector<40x32xf32>
    %cst_56 = arith.constant dense<0.000000e+00> : vector<8x32xf32>
    %148 = tpu.matmul %146, %147, %cst_56 {dimension_numbers = #tpu.dot_dimension_numbers<[1], [0], [0], [1], [0, 0, 1, 1], [], []>} : vector<8x40xf32>, vector<40x32xf32>, vector<8x32xf32> -> vector<8x32xf32>
    %149 = arith.addf %109, %148 : vector<8x32xf32>
    %c1 = arith.constant 1 : index
    %c0_57 = arith.constant 0 : index
    %c0_58 = arith.constant 0 : index
    %150 = vector.load %arg11[%c1, %c0_57, %c0_58] : memref<2x4x4xf32, #tpu.memory_space<vmem>>, vector<1x4x4xf32>
    %151 = vector.shape_cast %150 : vector<1x4x4xf32> to vector<4x4xf32>
    %cst_59 = arith.constant dense<0.000000e+00> : vector<8x4xf32>
    %152 = tpu.matmul %117, %151, %cst_59 {dimension_numbers = #tpu.dot_dimension_numbers<[1], [0], [0], [1], [0, 0, 1, 1], [], []>} : vector<8x4xf32>, vector<4x4xf32>, vector<8x4xf32> -> vector<8x4xf32>
    %cst_60 = arith.constant 0.000000e+00 : f32
    %153 = vector.broadcast %cst_60 : f32 to vector<8x4xf32>
    %154 = arith.cmpf ogt, %152, %153 : vector<8x4xf32>
    %cst_61 = arith.constant 0.00999999977 : f32
    %155 = vector.broadcast %cst_61 : f32 to vector<8x4xf32>
    %156 = arith.mulf %155, %152 : vector<8x4xf32>
    %157 = arith.select %154, %152, %156 : vector<8x4xi1>, vector<8x4xf32>
    %cst_62 = arith.constant dense<0.000000e+00> : vector<8x4xf32>
    %158 = tpu.matmul %101, %157, %cst_62 {dimension_numbers = #tpu.dot_dimension_numbers<[1], [0], [0], [1], [0, 0, 1, 1], [], []>} : vector<8x8xf32>, vector<8x4xf32>, vector<8x4xf32> -> vector<8x4xf32>
    %159 = vector.shape_cast %158 : vector<8x4xf32> to vector<8x4x1xf32>
    %160 = vector.shape_cast %158 : vector<8x4xf32> to vector<8x1x4xf32>
    %161 = vector.broadcast %159 : vector<8x4x1xf32> to vector<8x4x4xf32>
    %162 = vector.broadcast %160 : vector<8x1x4xf32> to vector<8x4x4xf32>
    %163 = arith.mulf %161, %162 : vector<8x4x4xf32>
    %164 = vector.shape_cast %163 : vector<8x4x4xf32> to vector<8x16xf32>
    %cst_63 = arith.constant dense<0.000000e+00> : vector<8x4xf32>
    %165 = tpu.matmul %102, %157, %cst_63 {dimension_numbers = #tpu.dot_dimension_numbers<[1], [0], [0], [1], [0, 0, 1, 1], [], []>} : vector<8x8xf32>, vector<8x4xf32>, vector<8x4xf32> -> vector<8x4xf32>
    %166 = vector.shape_cast %165 : vector<8x4xf32> to vector<8x4x1xf32>
    %167 = vector.shape_cast %165 : vector<8x4xf32> to vector<8x1x4xf32>
    %168 = vector.broadcast %166 : vector<8x4x1xf32> to vector<8x4x4xf32>
    %169 = vector.broadcast %167 : vector<8x1x4xf32> to vector<8x4x4xf32>
    %170 = arith.mulf %168, %169 : vector<8x4x4xf32>
    %cst_64 = arith.constant dense<0.000000e+00> : vector<8x4xf32>
    %171 = tpu.matmul %103, %157, %cst_64 {dimension_numbers = #tpu.dot_dimension_numbers<[1], [0], [0], [1], [0, 0, 1, 1], [], []>} : vector<8x8xf32>, vector<8x4xf32>, vector<8x4xf32> -> vector<8x4xf32>
    %172 = vector.shape_cast %171 : vector<8x4xf32> to vector<8x4x1xf32>
    %173 = vector.shape_cast %171 : vector<8x4xf32> to vector<8x1x4xf32>
    %174 = vector.broadcast %172 : vector<8x4x1xf32> to vector<8x4x4xf32>
    %175 = vector.broadcast %173 : vector<8x1x4xf32> to vector<8x4x4xf32>
    %176 = arith.mulf %174, %175 : vector<8x4x4xf32>
    %177 = arith.addf %170, %176 : vector<8x4x4xf32>
    %cst_65 = arith.constant dense<0.000000e+00> : vector<8x4xf32>
    %178 = tpu.matmul %104, %157, %cst_65 {dimension_numbers = #tpu.dot_dimension_numbers<[1], [0], [0], [1], [0, 0, 1, 1], [], []>} : vector<8x8xf32>, vector<8x4xf32>, vector<8x4xf32> -> vector<8x4xf32>
    %179 = vector.shape_cast %178 : vector<8x4xf32> to vector<8x4x1xf32>
    %180 = vector.shape_cast %178 : vector<8x4xf32> to vector<8x1x4xf32>
    %181 = vector.broadcast %179 : vector<8x4x1xf32> to vector<8x4x4xf32>
    %182 = vector.broadcast %180 : vector<8x1x4xf32> to vector<8x4x4xf32>
    %183 = arith.mulf %181, %182 : vector<8x4x4xf32>
    %184 = arith.addf %177, %183 : vector<8x4x4xf32>
    %185 = vector.shape_cast %184 : vector<8x4x4xf32> to vector<8x16xf32>
    %186 = tpu.concatenate %157, %158, %164, %185 in 1 : vector<8x4xf32>, vector<8x4xf32>, vector<8x16xf32>, vector<8x16xf32> -> vector<8x40xf32>
    %187 = vector.extract_strided_slice %105 {offsets = [40, 0], sizes = [40, 32], strides = [1, 1]} : vector<80x32xf32> to vector<40x32xf32>
    %cst_66 = arith.constant dense<0.000000e+00> : vector<8x32xf32>
    %188 = tpu.matmul %186, %187, %cst_66 {dimension_numbers = #tpu.dot_dimension_numbers<[1], [0], [0], [1], [0, 0, 1, 1], [], []>} : vector<8x40xf32>, vector<40x32xf32>, vector<8x32xf32> -> vector<8x32xf32>
    %189 = arith.addf %149, %188 : vector<8x32xf32>
    %cst_67 = arith.constant 0.000000e+00 : f32
    %190 = vector.broadcast %cst_67 : f32 to vector<8x32xf32>
    %191 = arith.cmpf ogt, %189, %190 : vector<8x32xf32>
    %cst_68 = arith.constant 0.00999999977 : f32
    %192 = vector.broadcast %cst_68 : f32 to vector<8x32xf32>
    %193 = arith.mulf %192, %189 : vector<8x32xf32>
    %194 = arith.select %191, %189, %193 : vector<8x32xi1>, vector<8x32xf32>
    %c0_69 = arith.constant 0 : index
    %c0_70 = arith.constant 0 : index
    %195 = vector.load %arg14[%c0_69, %c0_70] : memref<32x1xf32, #tpu.memory_space<vmem>>, vector<32x1xf32>
    %cst_71 = arith.constant dense<0.000000e+00> : vector<8x1xf32>
    %196 = tpu.matmul %194, %195, %cst_71 {dimension_numbers = #tpu.dot_dimension_numbers<[1], [0], [0], [1], [0, 0, 1, 1], [], []>} : vector<8x32xf32>, vector<32x1xf32>, vector<8x1xf32> -> vector<8x1xf32>
    %c0_72 = arith.constant 0 : index
    %c0_73 = arith.constant 0 : index
    %197 = vector.load %arg15[%c0_72, %c0_73] : memref<1x1xf32, #tpu.memory_space<vmem>>, vector<1x1xf32>
    %198 = vector.broadcast %197 : vector<1x1xf32> to vector<8x1xf32>
    %199 = arith.addf %196, %198 : vector<8x1xf32>
    %200 = arith.mulf %199, %25 : vector<8x1xf32>
    %c0_74 = arith.constant 0 : index
    %c0_75 = arith.constant 0 : index
    %201 = vector.load %arg8[%c0_74, %c0_75] : memref<1x8xf32, #tpu.memory_space<vmem>>, vector<1x8xf32>
    %cst_76 = arith.constant dense<0.000000e+00> : vector<1x1xf32>
    %202 = tpu.matmul %201, %200, %cst_76 {dimension_numbers = #tpu.dot_dimension_numbers<[1], [0], [0], [1], [0, 0, 1, 1], [], []>} : vector<1x8xf32>, vector<8x1xf32>, vector<1x1xf32> -> vector<1x1xf32>
    %c0_77 = arith.constant 0 : index
    %c0_78 = arith.constant 0 : index
    %c0_79 = arith.constant 0 : index
    %203 = vector.load %arg16[%c0_77, %c0_78, %c0_79] : memref<1x1x1xf32, #tpu.memory_space<vmem>>, vector<1x1x1xf32>
    %204 = vector.shape_cast %203 : vector<1x1x1xf32> to vector<1x1xf32>
    %205 = vector.shape_cast %202 : vector<1x1xf32> to vector<1x1x1xf32>
    tpu.vector_store %arg16[%c0_77, %c0_78, %c0_79], %205 {strides = array<i32>} : memref<1x1x1xf32, #tpu.memory_space<vmem>>, vector<1x1x1xf32>,
    return
  }
  func.func @transform_0(%arg0: i32) -> (i32, i32, i32) {
    %c0_i32 = arith.constant 0 : i32
    %c0_i32_0 = arith.constant 0 : i32
    %c0_i32_1 = arith.constant 0 : i32
    return %arg0, %c0_i32, %c0_i32_0 : i32, i32, i32
  }
  func.func @transform_1(%arg0: i32) -> (i32, i32, i32) {
    %c0_i32 = arith.constant 0 : i32
    %c0_i32_0 = arith.constant 0 : i32
    %c0_i32_1 = arith.constant 0 : i32
    return %arg0, %c0_i32, %c0_i32_0 : i32, i32, i32
  }
  func.func @transform_2(%arg0: i32) -> (i32, i32, i32) {
    %c0_i32 = arith.constant 0 : i32
    %c0_i32_0 = arith.constant 0 : i32
    %c0_i32_1 = arith.constant 0 : i32
    return %arg0, %c0_i32, %c0_i32_0 : i32, i32, i32
  }
  func.func @transform_3(%arg0: i32) -> (i32, i32, i32) {
    %c0_i32 = arith.constant 0 : i32
    %c0_i32_0 = arith.constant 0 : i32
    %c0_i32_1 = arith.constant 0 : i32
    return %arg0, %c0_i32, %c0_i32_0 : i32, i32, i32
  }
  func.func @transform_4(%arg0: i32) -> (i32, i32, i32) {
    %c0_i32 = arith.constant 0 : i32
    %c0_i32_0 = arith.constant 0 : i32
    %c0_i32_1 = arith.constant 0 : i32
    return %arg0, %c0_i32, %c0_i32_0 : i32, i32, i32
  }
  func.func @transform_5(%arg0: i32) -> (i32, i32, i32) {
    %c0_i32 = arith.constant 0 : i32
    %c0_i32_0 = arith.constant 0 : i32
    %c0_i32_1 = arith.constant 0 : i32
    return %arg0, %c0_i32, %c0_i32_0 : i32, i32, i32
  }
  func.func @transform_6(%arg0: i32) -> (i32, i32, i32) {
    %c0_i32 = arith.constant 0 : i32
    %c0_i32_0 = arith.constant 0 : i32
    %c0_i32_1 = arith.constant 0 : i32
    return %arg0, %c0_i32, %c0_i32_0 : i32, i32, i32
  }
  func.func @transform_7(%arg0: i32) -> (i32, i32) {
    %c0_i32 = arith.constant 0 : i32
    %c0_i32_0 = arith.constant 0 : i32
    %c0_i32_1 = arith.constant 0 : i32
    return %c0_i32, %c0_i32_0 : i32, i32
  }
  func.func @transform_8(%arg0: i32) -> (i32, i32) {
    %c0_i32 = arith.constant 0 : i32
    %c0_i32_0 = arith.constant 0 : i32
    %c0_i32_1 = arith.constant 0 : i32
    return %c0_i32, %c0_i32_0 : i32, i32
  }
  func.func @transform_9(%arg0: i32) -> (i32, i32, i32) {
    %c0_i32 = arith.constant 0 : i32
    %c0_i32_0 = arith.constant 0 : i32
    %c0_i32_1 = arith.constant 0 : i32
    %c0_i32_2 = arith.constant 0 : i32
    return %c0_i32, %c0_i32_0, %c0_i32_1 : i32, i32, i32
  }
  func.func @transform_10(%arg0: i32) -> (i32, i32, i32) {
    %c0_i32 = arith.constant 0 : i32
    %c0_i32_0 = arith.constant 0 : i32
    %c0_i32_1 = arith.constant 0 : i32
    %c0_i32_2 = arith.constant 0 : i32
    return %c0_i32, %c0_i32_0, %c0_i32_1 : i32, i32, i32
  }
  func.func @transform_11(%arg0: i32) -> (i32, i32) {
    %c0_i32 = arith.constant 0 : i32
    %c0_i32_0 = arith.constant 0 : i32
    %c0_i32_1 = arith.constant 0 : i32
    return %c0_i32, %c0_i32_0 : i32, i32
  }
  func.func @transform_12(%arg0: i32) -> (i32, i32) {
    %c0_i32 = arith.constant 0 : i32
    %c0_i32_0 = arith.constant 0 : i32
    %c0_i32_1 = arith.constant 0 : i32
    return %c0_i32, %c0_i32_0 : i32, i32
  }
  func.func @transform_13(%arg0: i32) -> (i32, i32) {
    %c0_i32 = arith.constant 0 : i32
    %c0_i32_0 = arith.constant 0 : i32
    %c0_i32_1 = arith.constant 0 : i32
    return %c0_i32, %c0_i32_0 : i32, i32
  }
  func.func @transform_14(%arg0: i32) -> (i32, i32) {
    %c0_i32 = arith.constant 0 : i32
    %c0_i32_0 = arith.constant 0 : i32
    %c0_i32_1 = arith.constant 0 : i32
    return %c0_i32, %c0_i32_0 : i32, i32
  }
  func.func @transform_15(%arg0: i32) -> (i32, i32, i32) {
    %c0_i32 = arith.constant 0 : i32
    %c0_i32_0 = arith.constant 0 : i32
    %c0_i32_1 = arith.constant 0 : i32
    return %arg0, %c0_i32, %c0_i32_0 : i32, i32, i32
  }
}

</mosaic_0001>

<bundles_post_ra>
// kernel: tpu_custom_call.1
= control target key start
LH: loop header
LB: loop body
LE: loop exit
PB: predicated region body
PF: predicated region fallthrough
CT: control target
= control target key end

     0   :  { %s4402_s20 = smov 0   ;;  %s5256_s0 = inlined_call_operand.vmem [shape: f32[2,8,4], index: 0, kind: input, shape index: {}]   ;;  %s5257_s1 = inlined_call_operand.vmem [shape: f32[2,8,1], index: 1, kind: input, shape index: {}]   ;;  %s5258_s2 = inlined_call_operand.vmem [shape: f32[2,1,8], index: 2, kind: input, shape index: {}]   ;;  %s5259_s3 = inlined_call_operand.vmem [shape: f32[2,8,3], index: 3, kind: input, shape index: {}]   ;;  %s5260_s4 = inlined_call_operand.vmem [shape: f32[2,3,8], index: 4, kind: input, shape index: {}]   ;;  %s5261_s5 = inlined_call_operand.vmem [shape: f32[2,8,1], index: 5, kind: input, shape index: {}]   ;;  %s5262_s6 = inlined_call_operand.vmem [shape: f32[2,1,8], index: 6, kind: input, shape index: {}]   ;;  %s5263_s7 = inlined_call_operand.vmem [shape: f32[1,8], index: 7, kind: input, shape index: {}]   ;;  %s5264_s8 = inlined_call_operand.vmem [shape: f32[12,4], index: 8, kind: input, shape index: {}]   ;;  %s5265_s9 = inlined_call_operand.vmem [shape: f32[1,4,4], index: 9, kind: input, shape index: {}]   ;;  %s5266_s10 = inlined_call_operand.vmem [shape: f32[2,4,4], index: 10, kind: input, shape index: {}]   ;;  %s5267_s11 = inlined_call_operand.vmem [shape: f32[80,32], index: 11, kind: input, shape index: {}]   ;;  %s5268_s12 = inlined_call_operand.vmem [shape: f32[1,32], index: 12, kind: input, shape index: {}]   ;;  %s5269_s13 = inlined_call_operand.vmem [shape: f32[32,1], index: 13, kind: input, shape index: {}]   ;;  %s5270_s14 = inlined_call_operand.<no memory space> [shape: f32[1,1], index: 14, kind: input, shape index: {}]   ;;  %s5271_s15 = inlined_call_operand.vmem [shape: f32[2,1,1], index: 15, kind: output, shape index: {}]  }
   0x1   :  { %v20_v0 = vstv %s5270_s14 }
   0x2   :  { %21 = vst [vmem:[#allocation2] sm:$0x1] %v20_v0 }
   0x3 LB: > { %s4051_s21 = sadd.s32 4294967295, %s4300_s20   ;;  %p4055_p0 = scmp.ge.s32.totalorder %s4300_s20, 1  ;;  %s4300_s20 = sphi %s4402_s20, %s27_s20  }
   0x4   : > { %p490_p1 = scmp.lt.s32.totalorder %s4300_s20, 3 }
   0x6   : > { %p491_p2 = pnand %p4055_p0, %p490_p1 }
   0x8   : > { %494 = sbr.rel (%p491_p2) target bundleno = 3062 (0xbf6), region = 80 }
   0xd   : > { %p557_p3 = scmp.lt.s32.totalorder %s4051_s21, 1  ;;  %v605_v1 = vlaneseq  ;;  %v4302_v2 = vmov 1   ;;  %v4303_v3 = vmov 0   ;;  %v5272_v5 = vmov 0.0   ;;  %s4305_s28 = smov 1  }
   0xe   : > { %4282 = vset.pattern.permute.xlu1 %v4302_v2  ;;  %4281 = vset.pattern.permute.xlu0 %v4303_v3  ;;  %s4306_s29 = smov 2   ;;  %v4307_v28 = vmov 2   ;;  %v4308_v30 = vmov 1966171168   ;;  %vm601_vm1 = vcmask 7168   ;;  %vm603_vm2 = vcmask 15360  }
   0xf   : > { %s5307_s21 = smov (!%p557_p3, %s4051_s21), 1  ;;  %v4412_v4 = vshrl.u32 %v605_v1, 7  ;;  %4142 = vmatprep.subr.mxu0 %v5272_v5  ;;  %4147 = vmatprep.subr.mxu1 %v5272_v5  ;;  %v664_v31 = vunpack.c.l.s4 %v4308_v30  ;;  %v4309_v45 = vmov 1983009808   ;;  %v4310_v1 = vmov 1934713408  }
  0x10   : > { %s4417_s14 = sshll.u32 %s5307_s21, 3  ;;  %v761_v46 = vunpack.c.l.s4 %v4309_v45  ;;  %v794_v2 = vunpack.c.l.s4 %v4310_v1  ;;  %vm4311_vm3 = vmmov 0   ;;  %vm1012_vm4 = vcmask 1043456   ;;  %s4314_s30 = smov 9  }
  0x11   : > { %v4420_v6 = vsub.s32 0, %v4412_v4  ;;  %s564_s24 = scalar_lea.vmem %s5257_s1, %s4417_s14  ;;  %s560_s27 = scalar_lea.vmem %s5256_s0, %s4417_s14  ;;  %v4431_v7 = vsub.s32 1, %v4412_v4  ;;  %v4436_v14 = vsub.s32 2, %v4412_v4  ;;  %v4439_v15 = vsub.s32 3, %v4412_v4  ;;  %4144 = vmatprep.mubr.msk.f32.mxu0 %vm4311_vm3, %v5272_v5  ;;  %4151 = vmatprep.mubr.msk.f32.mxu1 %vm4311_vm3, %v5272_v5 }
  0x12   : > { %v587_v8 = vld [vmem:[%s564_s24] sm:$0xff]  ;;  %v4444_v18 = vsub.s32 4, %v4412_v4  ;;  %v4447_v19 = vsub.s32 5, %v4412_v4  ;;  %v4452_v22 = vsub.s32 6, %v4412_v4  ;;  %v4455_v23 = vsub.s32 7, %v4412_v4  ;;  %s571_s17 = scalar_lea.vmem %s5259_s3, %s4417_s14  ;;  %s579_s22 = scalar_lea.vmem %s5261_s5, %s4417_s14 }
  0x13   : > { %v586_v9 = vld [vmem:[%s560_s27] sm:$0xff]  ;;  %v591_v10 = vmul.f32 0.11111111, %v587_v8  ;;  %vm845_vm0 = vcmp.gt.f32.partialorder %v587_v8, 0.0  ;;  %v665_v32 = vunpack.c.0.s8 %v664_v31  ;;  %v762_v56 = vunpack.c.0.s8 %v761_v46  ;;  %s4059_s14 = sshll.u32 %s5307_s21, 2  ;;  %s567_s18 = scalar_lea.vmem %s5258_s2, %s5307_s21 }
  0x14   : > { %v608_v11 = vrot.slane %v586_v9, %v4420_v6  ;;  %v615_v13 = vrot.slane %v586_v9, %v4431_v7  ;;  %v622_v16 = vrot.slane %v586_v9, %v4436_v14  ;;  %v629_v17 = vrot.slane %v586_v9, %v4439_v15  ;;  %v589_v26 = vld [vmem:[%s571_s17] sm:$0xff]  ;;  %s575_s25 = scalar_lea.vmem %s5260_s4, %s4059_s14  ;;  %s582_s14 = scalar_lea.vmem %s5262_s6, %s5307_s21 }
  0x15   : > { %594 = vrot.lane.b32.xlu0 %v591_v10, %s4305_s28  ;;  %v592_v12 = vmul.f32 %v591_v10, %v591_v10  ;;  %v636_v20 = vrot.slane %v586_v9, %v4444_v18  ;;  %v643_v21 = vrot.slane %v586_v9, %v4447_v19  ;;  %v650_v24 = vrot.slane %v586_v9, %v4452_v22  ;;  %v851_v27 = vld [vmem:[%s579_s22] sm:$0xff]  ;;  %s4312_s28 = smov 6   ;;  %s4315_s16 = smov 8  }
  0x16   : > { %610 = vbcast.lane.b32.xlu1 %v608_v11, 256  ;;  %v657_v25 = vrot.slane %v586_v9, %v4455_v23  ;;  %v4468_v29 = vsel %vm845_vm0, 1.0, %v5272_v5  ;;  %v4472_v35 = vsub.s32 %v665_v32, %v4412_v4  ;;  %vm839_vm10 = vcmask 23552   ;;  %s4316_s17 = smov 4  }
  0x17   : > { %5281 = vst [vmem:[#allocation3_spill] sm:$0xff] %v4468_v29  ;;  %vm841_vm11 = vcmask 48128   ;;  %vm843_vm12 = vcmask 72704   ;;  %vm932_vm13 = vcmask 64512   ;;  %vm1008_vm14 = vcmask 97280  }
  0x18   : > { %vm1160_vm0 = vcmask 31744  }
  0x19   : > { %598 = vrot.lane.b32.xlu0 %v592_v12, %s4306_s29  ;;  %v4488_v12 = vsub.s32 %v762_v56, %v4412_v4  ;;  %s4313_s29 = smov 3  }
  0x1a   : > { %617 = vbcast.lane.b32.xlu1 %v615_v13, 256 }
  0x1d   : > { %624 = vbcast.lane.b32.xlu0 %v622_v16, 256 }
  0x1e   : > { %631 = vbcast.lane.b32.xlu1 %v629_v17, 256 }
  0x21   : > { %638 = vbcast.lane.b32.xlu0 %v636_v20, 256 }
  0x22   : > { %645 = vbcast.lane.b32.xlu1 %v643_v21, 256 }
  0x25   : > { %652 = vbcast.lane.b32.xlu0 %v650_v24, 256 }
  0x26   : > { %659 = vbcast.lane.b32.xlu1 %v657_v25, 256 }
  0x29   : > { %882 = vperm.xlu0 %4281, %v589_v26  }
  0x2a   : > { %891 = vperm.xlu1 %4282, %v589_v26  }
  0x2d   : > { %855 = vperm.xlu0 %4281, %v851_v27   ;;  %v795_v27 = vunpack.c.0.s8 %v794_v2  ;;  %v588_v2 = vld [vmem:[%s567_s18] sm:$0x1]  ;;  %s4317_s18 = smov 12  }
  0x2e   : > { %4283 = vset.pattern.permute.xlu1 %v4307_v28  ;;  %vm848_vm7 = vcmp.gt.f32.partialorder %v588_v2, 0.0 }
  0x2f   : > { %900 = vperm.xlu1 %4283, %v589_v26  }
  0x31   : > { %4285 = vset.pattern.permute.xlu0 %v4307_v28 }
  0x33   : > { %4284 = vset.pattern.permute.xlu1 %v4303_v3 }
  0x34   : > { %869 = vperm.xlu1 %4284, %v4468_v29  }
  0x87   : > { %v595_v33 = vpop.permute.xlu0 %594 }
  0x88   : > { %v611_v34 = vpop.permute.xlu1 %610  ;;  %v602_v36 = vsel %vm601_vm1, 1.0, %v595_v33 }
  0x8b   : > { %v599_v37 = vpop.permute.xlu0 %598 }
  0x8c   : > { %v618_v38 = vpop.permute.xlu1 %617  ;;  %v604_v39 = vsel %vm603_vm2, %v602_v36, %v599_v37  ;;  %v4499_v37 = vsub.s32 %v795_v27, %v4412_v4 }
  0x8d   : > { %v662_v40 = vcombine.high %v604_v39, %v604_v39  ;;  %v669_v41 = vrot.slane %v604_v39, %v4472_v35 }
  0x8e   : > { %5282 = vst [vmem:[#allocation4_spill] sm:$0xff] %v4499_v37 }
  0x8f   : > { %v676_v42 = vrot.slane %v662_v40, %v4472_v35  ;;  %v677_v43 = vcombine.high %v669_v41, %v669_v41  ;;  %v685_v44 = vrot.slane %v669_v41, %v4472_v35  ;;  %v625_v47 = vpop.permute.xlu0 %624  ;;  %v590_v41 = vld [vmem:[%s575_s25] sm:$0x7] }
  0x90   : > { %v632_v48 = vpop.permute.xlu1 %631  ;;  %v888_v45 = vrot.slane %v590_v41, %v4420_v6 }
  0x91   : > { %v699_v49 = vrot.slane %v677_v43, %v4472_v35  ;;  %v707_v50 = vcombine.high %v685_v44, %v685_v44  ;;  %v692_v51 = vrot.slane %v676_v42, %v4472_v35  ;;  %v714_v52 = vrot.slane %v685_v44, %v4420_v6 }
  0x92   : > { %v678_v53 = vcombine.high %v676_v42, %v676_v42  ;;  %v1007_v42 = vld [vmem:[%s5264_s8 + $0x8] sm:$0xf]  ;;  %v897_v44 = vrot.slane %v590_v41, %v4431_v7 }
  0x93   : > { %v718_v54 = vrot.slane %v699_v49, %v4420_v6  ;;  %v722_v55 = vrot.slane %v707_v50, %v4420_v6  ;;  %v709_v57 = vcombine.high %v699_v49, %v699_v49  ;;  %v639_v58 = vpop.permute.xlu0 %638  ;;  %v730_v60 = vrot.slane %v692_v51, %v4420_v6  ;;  %4148 = vmatpush3.msk.msra.mxu1 %vm1012_vm4, %v1007_v42 }
  0x94   : > { %v646_v59 = vpop.permute.xlu1 %645  ;;  %v706_v61 = vrot.slane %v678_v53, %v4472_v35  ;;  %v708_v62 = vcombine.high %v692_v51, %v692_v51  ;;  %v751_v3 = vmul.f32 %v714_v52, %v611_v34  ;;  %4149 = vmatprep.subr.mxu1 %v5272_v5 }
  0x95   : > { %v753_v63 = vmul.f32 %v722_v55, %v625_v47  ;;  %v726_v0 = vrot.slane %v709_v57, %v4420_v6  ;;  %v752_v11 = vmul.f32 %v718_v54, %v618_v38  ;;  %v755_v21 = vmul.f32 %v730_v60, %v639_v58 }
  0x96   : > { %v734_v8 = vrot.slane %v706_v61, %v4420_v6  ;;  %v738_v9 = vrot.slane %v708_v62, %v4420_v6  ;;  %v710_v10 = vcombine.high %v706_v61, %v706_v61  ;;  %v906_v57 = vrot.slane %v590_v41, %v4436_v14 }
  0x97   : > { %v754_v13 = vmul.f32 %v726_v0, %v632_v48  ;;  %v653_v16 = vpop.permute.xlu0 %652  ;;  %v759_v20 = vcombine.low %v751_v3, %v753_v63 }
  0x98   : > { %v660_v17 = vpop.permute.xlu1 %659  ;;  %v757_v24 = vmul.f32 %v738_v9, %v653_v16  ;;  %v742_v25 = vrot.slane %v710_v10, %v4420_v6  ;;  %v756_v28 = vmul.f32 %v734_v8, %v646_v59 }
  0x99   : > { %v767_v26 = vcombine.low %v752_v11, %v754_v13  ;;  %v766_v33 = vrot.slane %v759_v20, %v4488_v12  ;;  %v4062_v13 = vsel %vm848_vm7, 1.0, %v5272_v5  ;;  %vm3787_vm7 = vcmask 261120  }
  0x9a   : > { %v775_v30 = vcombine.low %v755_v21, %v757_v24  ;;  %v758_v31 = vmul.f32 %v742_v25, %v660_v17  ;;  %v4063_v17 = vld [vmem:[%s582_s14] ss:$0 sm:$0xff]  ;;  %v876_v24 = vrot.slane %v4062_v13, %v4420_v6  ;;  %v4081_v13 = vld [vmem:[%s5266_s10 + $0x4] sm:$0xf] }
  0x9b   : > { %v774_v32 = vrot.slane %v767_v26, %v4488_v12 }
  0x9c   : > { %v782_v34 = vrot.slane %v775_v30, %v4488_v12  ;;  %v783_v36 = vcombine.low %v756_v28, %v758_v31 }
  0x9d   : > { %v791_v38 = vcombine.low %v766_v33, %v774_v32  ;;  %v792_v39 = vcombine.high %v766_v33, %v774_v32 }
  0x9e   : > { %v790_v40 = vrot.slane %v783_v36, %v4488_v12 }
  0x9f   : > { %v806_v46 = vrot.slane %v792_v39, %v4499_v37  ;;  %v4516_v48 = vrot.slane %v791_v38, %v4499_v37 }
  0xa0   : > { %v807_v43 = vcombine.low %v782_v34, %v790_v40  ;;  %v808_v4 = vcombine.high %v782_v34, %v790_v40 }
  0xa2   : > { %v822_v47 = vrot.slane %v808_v4, %v4499_v37  ;;  %v815_v49 = vrot.slane %v807_v43, %v4499_v37 }
  0xa4   : > { %v825_v50 = vcombine.low %v806_v46, %v822_v47  ;;  %v824_v51 = vcombine.high %v4516_v48, %v815_v49  ;;  %v883_v53 = vpop.permute.xlu0 %882  ;;  %v823_v54 = vcombine.low %v4516_v48, %v815_v49  ;;  %v826_v60 = vcombine.high %v806_v46, %v822_v47  ;;  %v1006_v47 = vld [vmem:[%s5264_s8] sm:$0xff] }
  0xa5   : > { %v892_v52 = vpop.permute.xlu1 %891  ;;  %v4523_v56 = vsub.f32 %v883_v53, %v888_v45  ;;  %4150 = vmatpush3.msra.mxu1 %v1006_v47 }
  0xa6   : > { %v4521_v55 = vsub.f32 %v892_v52, %v897_v44  ;;  %832 = vrot.lane.b32.xlu1 %v825_v50, %s4312_s28  ;;  %828 = vrot.lane.b32.xlu0 %v824_v51, %s4313_s29 }
  0xa7   : > { %v908_v59 = vmul.f32 %v4523_v56, %v4523_v56  ;;  %4159 = vmatprep.subr.mxu1 %v5272_v5 }
  0xa8   : > { %v909_v58 = vmul.f32 %v4521_v55, %v4521_v55  ;;  %v856_v20 = vpop.permute.xlu0 %855 }
  0xa9   : > { %vm864_vm8 = vcmp.eq.f32.partialorder %v856_v20, %v4063_v17 }
  0xaa   : > { %v901_v61 = vpop.permute.xlu1 %900  ;;  %v910_v62 = vadd.f32 %v909_v58, %v908_v59  ;;  %836 = vrot.lane.b32.xlu0 %v826_v60, %s4314_s30  ;;  %v4064_v27 = vsel %vm864_vm8, 1.0, %v5272_v5  ;;  %v1266_v59 = vld [vmem:[%s5266_s10] sm:$0xf]  ;;  %s4318_s30 = smov 24   ;;  %vm3936_vm8 = vcmask 0  }
  0xab   : > { %v4530_v63 = vsub.f32 %v901_v61, %v906_v57 }
  0xad   : > { %v911_v0 = vmul.f32 %v4530_v63, %v4530_v63 }
  0xaf   : > { %v912_v1 = vadd.f32 %v911_v0, %v910_v62  ;;  %v4544_v25 = vpop.permute.xlu1 %869 }
  0xb0   : > { %v878_v26 = vmul.f32 %v876_v24, %v4544_v25 }
  0xb1   : > { %4286 = vrsqrt.f32 %v912_v1  ;;  %vm915_vm5 = vcmp.eq.f32.partialorder %v912_v1, inf  ;;  %v918_v8 = vand.u32 2147483648, %v912_v1  ;;  %vm917_vm6 = vcmp.eq.f32.partialorder %v912_v1, 0.0 }
  0xb2   : > { %v879_v28 = vmul.f32 %v4064_v27, %v878_v26 }
  0xbe   : > { %v4287_v3 = vpop.eup %4286 }
  0xbf   : > { %v914_v9 = vmul.f32 %v4287_v3, %v912_v1 }
  0xc1   : > { %v916_v10 = vsel %vm915_vm5, %v912_v1, %v914_v9  ;;  %vm2449_vm5 = vcmask 195584  }
  0xc2   : > { %v919_v11 = vsel %vm917_vm6, %v918_v8, %v916_v10  ;;  %vm2451_vm6 = vcmask 326656  }
  0xc3   : > { %v1241_v16 = vsub.f32 0.0, %v919_v11  ;;  %vm920_vm9 = vcmp.lt.f32.partialorder %v919_v11, 10.0  ;;  %v924_v34 = vsub.f32 5.0, %v919_v11 }
  0xc4   : > { %v4065_v30 = vsel %vm920_vm9, 1.0, %v5272_v5 }
  0xc5   : > { %v1242_v21 = vmul.f32 1.442695, %v1241_v16  ;;  %v923_v31 = vmul.f32 %v4065_v30, %v879_v28  ;;  %v4066_v36 = vmul.f32 -1.442695, %v924_v34 }
  0xc7   : > { %4288 = vpow2.f32 %v1242_v21 }
  0xc8   : > { %4290 = vpow2.f32 %v4066_v36 }
  0xd4   : > { %v4289_v32 = vpop.eup %4288 }
  0xd5   : > { %v4549_v33 = vmul.f32 %v4289_v32, %v923_v31  ;;  %v4291_v38 = vpop.eup %4290 }
  0xd6   : > { %v928_v39 = vadd.f32 1.0, %v4291_v38 }
  0xd7   : > { %v1245_v10 = vmul.f32 %v4549_v33, %v4523_v56  ;;  %v4598_v56 = vmul.f32 %v4549_v33, %v4521_v55  ;;  %v1247_v11 = vmul.f32 %v4549_v33, %v4530_v63 }
  0xd8   : > { %4292 = vrcp.f32 %v928_v39 }
  0xe5   : > { %v4293_v43 = vpop.eup %4292 }
  0xe6   : > { %v931_v46 = vmul.f32 %v4293_v43, %v923_v31 }
 0x118   : > { %v829_v40 = vpop.permute.xlu0 %828  ;;  %v833_v42 = vpop.permute.xlu1 %832 }
 0x119   : > { %v840_v41 = vsel %vm839_vm10, %v823_v54, %v829_v40  ;;  %v1159_v54 = vld [vmem:[%s5265_s9] sm:$0xf] }
 0x11a   : > { %v842_v4 = vsel %vm841_vm11, %v840_v41, %v833_v42 }
 0x11c   : > { %v837_v44 = vpop.permute.xlu0 %836 }
 0x11d   : > { %v844_v45 = vsel %vm843_vm12, %v842_v4, %v837_v44 }
 0x11e   : > { %4143 = vmatpush3.msra.mxu0 %v844_v45 }
 0x11f   : > { %4145 = vmatmul.mubr.msk.f32.vlgmr.msra.gmra.mxu0 %vm932_vm13, %v931_v46  ;;  %4154 = vmatprep.subr.mxu0 %v5272_v5 }
 0x120   : > { %4156 = vmatprep.mubr.msk.f32.mxu0 %vm4311_vm3, %v5272_v5 }
 0x1df   : > { %v1002_v48 = vpop.f32.mrf.mxu0 }
 0x1e0   : > { %4152 = vmatmul.mubr.msk.f32.vlgmr.msra.gmra.mxu1 %vm1008_vm14, %v1002_v48 }
 0x1e1   : > { %v4146_v49 = vpop.f32.mrf.mxu0  ;;  %4161 = vmatprep.mubr.msk.f32.mxu1 %vm4311_vm3, %v5272_v5  ;;  %4160 = vmatpush3.msk.msra.mxu1 %vm1012_vm4, %v1159_v54 }
 0x1e2   : > { %4169 = vmatprep.subr.mxu1 %v5272_v5 }
 0x2a0   : > { %v1082_v50 = vpop.f32.mrf.mxu1 }
 0x2a1   : > { %vm1086_vm15 = vcmp.gt.f32.partialorder %v1082_v50, 0.0  ;;  %v1087_v51 = vmul.f32 0.01, %v1082_v50 }
 0x2a2   : > { %v4153_v52 = vpop.f32.mrf.mxu1 }
 0x2a3   : > { %v1088_v53 = vsel %vm1086_vm15, %v1082_v50, %v1087_v51 }
 0x2a4   : > { %4155 = vmatpush3.msra.mxu0 %v1088_v53 }
 0x2a5   : > { %4157 = vmatmul.mubr.msk.f32.vlgmr.msra.gmra.mxu0 %vm932_vm13, %v931_v46  ;;  %4164 = vmatprep.subr.mxu0 %v5272_v5 }
 0x2a6   : > { %4166 = vmatprep.mubr.msk.f32.mxu0 %vm4311_vm3, %v5272_v5  ;;  %4165 = vmatpush3.msk.msra.mxu0 %vm1012_vm4, %v1266_v59 }
 0x2a7   : > { %4174 = vmatprep.subr.mxu0 %v5272_v5 }
 0x365   : > { %v1155_v57 = vpop.f32.mrf.mxu0 }
 0x366   : > { %4162 = vmatmul.mubr.msk.f32.vlgmr.msra.gmra.mxu1 %vm1160_vm0, %v1155_v57 }
 0x367   : > { %v4158_v58 = vpop.f32.mrf.mxu0  ;;  %4171 = vmatprep.mubr.msk.f32.mxu1 %vm4311_vm3, %v5272_v5 }
 0x426   : > { %v1233_v60 = vpop.f32.mrf.mxu1 }
 0x427   : > { %vm1237_vm1 = vcmp.gt.f32.partialorder %v1233_v60, 0.0  ;;  %v1238_v61 = vmul.f32 0.01, %v1233_v60 }
 0x428   : > { %v4163_v62 = vpop.f32.mrf.mxu1 }
 0x429   : > { %v1239_v0 = vsel %vm1237_vm1, %v1233_v60, %v1238_v61 }
 0x42a   : > { %v1240_v1 = vmul.f32 %v1239_v0, %v4544_v25 }
 0x42c   : > { %4167 = vmatmul.mubr.msk.f32.vlgmr.msra.gmra.mxu0 %vm1160_vm0, %v1240_v1 }
 0x42d   : > { %4176 = vmatprep.mubr.msk.f32.mxu0 %vm4311_vm3, %v5272_v5 }
 0x4ec   : > { %v1339_v2 = vpop.f32.mrf.mxu0 }
 0x4ed   : > { %vm1343_vm2 = vcmp.gt.f32.partialorder %v1339_v2, 0.0  ;;  %v1344_v3 = vmul.f32 0.01, %v1339_v2 }
 0x4ee   : > { %v4168_v8 = vpop.f32.mrf.mxu0 }
 0x4ef   : > { %v4583_v9 = vsel %vm1343_vm2, %v1339_v2, %v1344_v3 }
 0x4f0   : > { %4170 = vmatpush3.msra.mxu1 %v4583_v9  ;;  %4175 = vmatpush3.msra.mxu0 %v4583_v9 }
 0x4f1   : > { %4172 = vmatmul.mubr.msk.f32.vlgmr.msra.gmra.mxu1 %vm932_vm13, %v4549_v33  ;;  %4177 = vmatmul.mubr.msk.f32.vlgmr.msra.gmra.mxu0 %vm932_vm13, %v1245_v10 }
 0x4f2   : > { %4179 = vmatprep.subr.mxu1 %v5272_v5  ;;  %4184 = vmatprep.subr.mxu0 %v5272_v5 }
 0x4f3   : > { %4180 = vmatpush3.msra.mxu1 %v4583_v9  ;;  %4185 = vmatpush3.msra.mxu0 %v4583_v9 }
 0x4f4   : > { %4181 = vmatprep.mubr.msk.f32.mxu1 %vm4311_vm3, %v5272_v5  ;;  %4186 = vmatprep.mubr.msk.f32.mxu0 %vm4311_vm3, %v5272_v5 }
 0x4f5   : > { %4182 = vmatmul.mubr.msk.f32.vlgmr.msra.gmra.mxu1 %vm932_vm13, %v4598_v56  ;;  %4187 = vmatmul.mubr.msk.f32.vlgmr.msra.gmra.mxu0 %vm932_vm13, %v1247_v11 }
 0x4f6   : > { %4202 = vmatprep.subr.mxu0 %v5272_v5  ;;  %4204 = vmatprep.mubr.msk.f32.mxu0 %vm4311_vm3, %v5272_v5 }
 0x4f7   : > { %4203 = vmatpush3.msk.msra.mxu0 %vm1012_vm4, %v4081_v13  ;;  %4189 = vmatprep.subr.mxu1 %v5272_v5 }
 0x4f8   : > { %4207 = vmatprep.subr.mxu0 %v5272_v5  ;;  %4199 = vmatprep.mubr.msk.f32.mxu1 %vm4311_vm3, %v5272_v5 }
 0x4f9   : > { %4205 = vmatmul.mubr.msk.f32.vlgmr.msra.gmra.mxu0 %vm1160_vm0, %v4583_v9 }
 0x4fa   : > { %4209 = vmatprep.mubr.msk.f32.mxu0 %vm4311_vm3, %v5272_v5 }
 0x5b1   : > { %v4624_v55 = vpop.f32.mrf.mxu1  ;;  %v4626_v63 = vpop.f32.mrf.mxu0 }
 0x5b2   : > { %v1739_v16 = vrot.slane %v4626_v63, %v4431_v7  ;;  %v1732_v17 = vrot.slane %v4626_v63, %v4420_v6  ;;  %v1753_v26 = vrot.slane %v4626_v63, %v4439_v15  ;;  %v1746_v27 = vrot.slane %v4626_v63, %v4436_v14 }
 0x5b3   : > { %v4173_v20 = vpop.f32.mrf.mxu1  ;;  %v4178_v21 = vpop.f32.mrf.mxu0  ;;  %v1767_v34 = vrot.slane %v4626_v63, %v4447_v19  ;;  %v1760_v36 = vrot.slane %v4626_v63, %v4444_v18  ;;  %v1781_v40 = vrot.slane %v4626_v63, %v4455_v23  ;;  %v1774_v41 = vrot.slane %v4626_v63, %v4452_v22 }
 0x5b4   : > { %1741 = vbcast.lane.b32.xlu0 %v1739_v16, 256  ;;  %1734 = vbcast.lane.b32.xlu1 %v1732_v17, 256  ;;  %v1422_v42 = vrot.slane %v4624_v55, %v4420_v6  ;;  %v1443_v43 = vrot.slane %v4624_v55, %v4439_v15  ;;  %v1436_v4 = vrot.slane %v4624_v55, %v4436_v14 }
 0x5b5   : > { %v4632_v24 = vpop.f32.mrf.mxu1  ;;  %v4634_v25 = vpop.f32.mrf.mxu0  ;;  %v1457_v44 = vrot.slane %v4624_v55, %v4447_v19  ;;  %v1450_v45 = vrot.slane %v4624_v55, %v4444_v18  ;;  %v1471_v1 = vrot.slane %v4624_v55, %v4455_v23  ;;  %v1464_v2 = vrot.slane %v4624_v55, %v4452_v22 }
 0x5b6   : > { %v1966_v46 = vrot.slane %v4632_v24, %v4431_v7  ;;  %v1959_v47 = vrot.slane %v4632_v24, %v4420_v6  ;;  %v1980_v48 = vrot.slane %v4632_v24, %v4439_v15  ;;  %v1973_v49 = vrot.slane %v4632_v24, %v4436_v14 }
 0x5b7   : > { %v4183_v28 = vpop.f32.mrf.mxu1  ;;  %v4188_v30 = vpop.f32.mrf.mxu0  ;;  %v1994_v50 = vrot.slane %v4632_v24, %v4447_v19  ;;  %v1987_v51 = vrot.slane %v4632_v24, %v4444_v18  ;;  %v2008_v52 = vrot.slane %v4632_v24, %v4455_v23  ;;  %v2001_v53 = vrot.slane %v4632_v24, %v4452_v22 }
 0x5b8   : > { %1755 = vbcast.lane.b32.xlu0 %v1753_v26, 256  ;;  %1748 = vbcast.lane.b32.xlu1 %v1746_v27, 256  ;;  %v2201_v54 = vrot.slane %v4634_v25, %v4431_v7  ;;  %v2194_v57 = vrot.slane %v4634_v25, %v4420_v6  ;;  %v2215_v58 = vrot.slane %v4634_v25, %v4439_v15 }
 0x5b9   : > { %v2600_v31 = vpop.f32.mrf.mxu0  ;;  %v2208_v59 = vrot.slane %v4634_v25, %v4436_v14  ;;  %v2229_v60 = vrot.slane %v4634_v25, %v4447_v19  ;;  %v2222_v61 = vrot.slane %v4634_v25, %v4444_v18  ;;  %v2243_v62 = vrot.slane %v4634_v25, %v4455_v23 }
 0x5ba   : > { %vm2604_vm4 = vcmp.gt.f32.partialorder %v2600_v31, 0.0  ;;  %v2605_v32 = vmul.f32 0.01, %v2600_v31  ;;  %v2236_v0 = vrot.slane %v4634_v25, %v4452_v22  ;;  %v1793_v21 = vrot.slane %v4626_v63, %v4472_v35 }
 0x5bb   : > { %v4206_v38 = vpop.f32.mrf.mxu0  ;;  %v2020_v26 = vrot.slane %v4632_v24, %v4472_v35  ;;  %v1786_v27 = vcombine.high %v4626_v63, %v4626_v63 }
 0x5bc   : > { %v4644_v39 = vsel %vm2604_vm4, %v2600_v31, %v2605_v32  ;;  %1769 = vbcast.lane.b32.xlu0 %v1767_v34, 256  ;;  %1762 = vbcast.lane.b32.xlu1 %v1760_v36, 256  ;;  %v1801_v31 = vcombine.high %v1793_v21, %v1793_v21  ;;  %v2013_v34 = vcombine.high %v4632_v24, %v4632_v24 }
 0x5bd   : > { %5283 = vst [vmem:[#allocation5_spill] sm:$0xff] %v4644_v39  ;;  %4208 = vmatpush3.msra.mxu0 %v4644_v39  ;;  %v2028_v32 = vcombine.high %v2020_v26, %v2020_v26  ;;  %v1809_v36 = vrot.slane %v1793_v21, %v4472_v35  ;;  %v1800_v38 = vrot.slane %v1786_v27, %v4472_v35 }
 0x5be   : > { %4210 = vmatmul.mubr.msk.f32.vlgmr.msra.gmra.mxu0 %vm932_vm13, %v4549_v33  ;;  %4212 = vmatprep.subr.mxu0 %v5272_v5  ;;  %v1429_v33 = vrot.slane %v4624_v55, %v4431_v7 }
 0x5bf   : > { %4213 = vmatpush3.msra.mxu0 %v4644_v39  ;;  %4214 = vmatprep.mubr.msk.f32.mxu0 %vm4311_vm3, %v5272_v5  ;;  %v2050_v63 = vrot.slane %v2028_v32, %v4472_v35 }
 0x5c0   : > { %1783 = vbcast.lane.b32.xlu0 %v1781_v40, 256  ;;  %1776 = vbcast.lane.b32.xlu1 %v1774_v41, 256 }
 0x5c1   : > { %4222 = vmatprep.subr.mxu0 %v5272_v5 }
 0x5c2   : > { %4215 = vmatmul.mubr.msk.f32.vlgmr.msra.gmra.mxu0 %vm932_vm13, %v1245_v10 }
 0x5c3   : > { %4223 = vmatpush3.msra.mxu0 %v4644_v39  ;;  %4224 = vmatprep.mubr.msk.f32.mxu0 %vm4311_vm3, %v5272_v5 }
 0x5c4   : > { %1431 = vbcast.lane.b32.xlu0 %v1429_v33, 256  ;;  %1424 = vbcast.lane.b32.xlu1 %v1422_v42, 256  ;;  %v1823_v33 = vrot.slane %v1801_v31, %v4472_v35  ;;  %v2036_v42 = vrot.slane %v2020_v26, %v4472_v35  ;;  %v2255_v31 = vrot.slane %v4634_v25, %v4472_v35 }
 0x5c5   : > { %4240 = vmatprep.subr.mxu0 %v5272_v5 }
 0x5c6   : > { %4225 = vmatmul.mubr.msk.f32.vlgmr.msra.gmra.mxu0 %vm932_vm13, %v1247_v11 }
 0x5c7   : > { %4248 = vmatprep.mubr.msk.f32.mxu0 %vm4311_vm3, %v5272_v5 }
 0x5c8   : > { %1445 = vbcast.lane.b32.xlu0 %v1443_v43, 256  ;;  %1438 = vbcast.lane.b32.xlu1 %v1436_v4, 256  ;;  %v2027_v43 = vrot.slane %v2013_v34, %v4472_v35  ;;  %v1831_v4 = vcombine.high %v1809_v36, %v1809_v36 }
 0x5ca   : > { %v2043_v27 = vrot.slane %v2027_v43, %v4472_v35 }
 0x5cc   : > { %1459 = vbcast.lane.b32.xlu0 %v1457_v44, 256  ;;  %1452 = vbcast.lane.b32.xlu1 %v1450_v45, 256  ;;  %v1802_v44 = vcombine.high %v1800_v38, %v1800_v38 }
 0x5d0   : > { %1968 = vbcast.lane.b32.xlu0 %v1966_v46, 256  ;;  %1961 = vbcast.lane.b32.xlu1 %v1959_v47, 256  ;;  %v1842_v46 = vrot.slane %v1823_v33, %v4420_v6  ;;  %v1838_v47 = vrot.slane %v1809_v36, %v4420_v6 }
 0x5d4   : > { %1982 = vbcast.lane.b32.xlu0 %v1980_v48, 256  ;;  %1975 = vbcast.lane.b32.xlu1 %v1973_v49, 256  ;;  %v1833_v48 = vcombine.high %v1823_v33, %v1823_v33  ;;  %v2060_v49 = vcombine.high %v2050_v63, %v2050_v63 }
 0x5d6   : > { %v1850_v21 = vrot.slane %v1833_v48, %v4420_v6  ;;  %v2077_v26 = vrot.slane %v2060_v49, %v4420_v6  ;;  %v2081_v48 = vrot.slane %v2043_v27, %v4420_v6  ;;  %v2059_v49 = vcombine.high %v2043_v27, %v2043_v27 }
 0x5d8   : > { %1996 = vbcast.lane.b32.xlu0 %v1994_v50, 256  ;;  %1989 = vbcast.lane.b32.xlu1 %v1987_v51, 256  ;;  %v2069_v50 = vrot.slane %v2050_v63, %v4420_v6  ;;  %v2065_v51 = vrot.slane %v2036_v42, %v4420_v6 }
 0x5dc   : > { %2010 = vbcast.lane.b32.xlu0 %v2008_v52, 256  ;;  %2003 = vbcast.lane.b32.xlu1 %v2001_v53, 256  ;;  %v2058_v52 = vcombine.high %v2036_v42, %v2036_v42  ;;  %v2029_v53 = vcombine.high %v2027_v43, %v2027_v43 }
 0x5de   : > { %v2073_v36 = vrot.slane %v2058_v52, %v4420_v6 }
 0x5e0   : > { %2203 = vbcast.lane.b32.xlu0 %v2201_v54, 256  ;;  %2196 = vbcast.lane.b32.xlu1 %v2194_v57, 256  ;;  %v1846_v54 = vrot.slane %v1831_v4, %v4420_v6  ;;  %v1830_v57 = vrot.slane %v1802_v44, %v4472_v35 }
 0x5e2   : > { %v1834_v33 = vcombine.high %v1830_v57, %v1830_v57 }
 0x5e4   : > { %2217 = vbcast.lane.b32.xlu0 %v2215_v58, 256  ;;  %2210 = vbcast.lane.b32.xlu1 %v2208_v59, 256  ;;  %v1816_v58 = vrot.slane %v1800_v38, %v4472_v35  ;;  %v1483_v59 = vrot.slane %v4624_v55, %v4472_v35 }
 0x5e6   : > { %v1854_v38 = vrot.slane %v1816_v58, %v4420_v6  ;;  %v1832_v63 = vcombine.high %v1816_v58, %v1816_v58  ;;  %v1491_v58 = vcombine.high %v1483_v59, %v1483_v59 }
 0x5e8   : > { %2231 = vbcast.lane.b32.xlu0 %v2229_v60, 256  ;;  %2224 = vbcast.lane.b32.xlu1 %v2222_v61, 256 }
 0x5ec   : > { %2245 = vbcast.lane.b32.xlu0 %v2243_v62, 256  ;;  %2238 = vbcast.lane.b32.xlu1 %v2236_v0, 256 }
 0x5f0   : > { %1473 = vbcast.lane.b32.xlu0 %v1471_v1, 256  ;;  %1466 = vbcast.lane.b32.xlu1 %v1464_v2, 256 }
 0x626   : > { %v1742_v3 = vpop.permute.xlu0 %1741  ;;  %v1735_v8 = vpop.permute.xlu1 %1734 }
 0x627   : > { %v1876_v62 = vmul.f32 %v1842_v46, %v1742_v3  ;;  %v1875_v0 = vmul.f32 %v1838_v47, %v1735_v8  ;;  %v2057_v3 = vrot.slane %v2029_v53, %v4472_v35  ;;  %v1858_v8 = vrot.slane %v1830_v57, %v4420_v6 }
 0x628   : > { %v1862_v57 = vrot.slane %v1832_v63, %v4420_v6 }
 0x62a   : > { %v1756_v10 = vpop.permute.xlu0 %1755  ;;  %v1749_v11 = vpop.permute.xlu1 %1748 }
 0x62b   : > { %v1878_v43 = vmul.f32 %v1850_v21, %v1756_v10  ;;  %v1877_v44 = vmul.f32 %v1846_v54, %v1749_v11  ;;  %v1476_v10 = vcombine.high %v4624_v55, %v4624_v55 }
 0x62e   : > { %v4714_v13 = vpop.permute.xlu0 %1769  ;;  %v4716_v16 = vpop.permute.xlu1 %1762 }
 0x632   : > { %v4718_v17 = vpop.permute.xlu0 %1783  ;;  %v4720_v20 = vpop.permute.xlu1 %1776 }
 0x636   : > { %v4728_v28 = vpop.permute.xlu0 %1431  ;;  %v4730_v30 = vpop.permute.xlu1 %1424 }
 0x63a   : > { %v4736_v40 = vpop.permute.xlu0 %1445  ;;  %v4738_v41 = vpop.permute.xlu1 %1438 }
 0x63e   : > { %v4744_v45 = vpop.permute.xlu0 %1459  ;;  %v4746_v24 = vpop.permute.xlu1 %1452 }
 0x642   : > { %v1969_v60 = vpop.permute.xlu0 %1968  ;;  %v1962_v61 = vpop.permute.xlu1 %1961 }
 0x643   : > { %v2103_v1 = vmul.f32 %v2069_v50, %v1969_v60  ;;  %v2102_v2 = vmul.f32 %v2065_v51, %v1962_v61  ;;  %v2263_v50 = vcombine.high %v2255_v31, %v2255_v31  ;;  %v2248_v51 = vcombine.high %v4634_v25, %v4634_v25 }
 0x644   : > { %v2085_v60 = vrot.slane %v2057_v3, %v4420_v6  ;;  %v2061_v61 = vcombine.high %v2057_v3, %v2057_v3  ;;  %v1866_v25 = vrot.slane %v1834_v33, %v4420_v6 }
 0x645   : > { %v4762_v32 = vadd.f32 %v2103_v1, %v1876_v62  ;;  %v4764_v34 = vadd.f32 %v2102_v2, %v1875_v0  ;;  %v1880_v62 = vmul.f32 %v1858_v8, %v4714_v13  ;;  %v1879_v0 = vmul.f32 %v1854_v38, %v4716_v16 }
 0x646   : > { %v1983_v42 = vpop.permute.xlu0 %1982  ;;  %v1976_v4 = vpop.permute.xlu1 %1975  ;;  %v2285_v21 = vrot.slane %v2263_v50, %v4472_v35  ;;  %v2262_v27 = vrot.slane %v2248_v51, %v4472_v35  ;;  %v2093_v63 = vrot.slane %v2061_v61, %v4420_v6  ;;  %v2089_v13 = vrot.slane %v2059_v49, %v4420_v6 }
 0x647   : > { %v2105_v46 = vmul.f32 %v2077_v26, %v1983_v42  ;;  %v2104_v47 = vmul.f32 %v2073_v36, %v1976_v4  ;;  %v2271_v26 = vrot.slane %v2255_v31, %v4472_v35  ;;  %v1499_v16 = vrot.slane %v1483_v59, %v4472_v35 }
 0x648   : > { %v1490_v8 = vrot.slane %v1476_v10, %v4472_v35  ;;  %v1882_v42 = vmul.f32 %v1866_v25, %v4718_v17  ;;  %v1881_v31 = vmul.f32 %v1862_v57, %v4720_v20  ;;  %v2304_v59 = vrot.slane %v2285_v21, %v4420_v6 }
 0x649   : > { %v2113_v52 = vadd.f32 %v2105_v46, %v1878_v43  ;;  %v2112_v53 = vadd.f32 %v2104_v47, %v1877_v44  ;;  %v1513_v44 = vrot.slane %v1491_v58, %v4472_v35  ;;  %v2300_v46 = vrot.slane %v2271_v26, %v4420_v6 }
 0x64a   : > { %v1997_v11 = vpop.permute.xlu0 %1996  ;;  %v1990_v54 = vpop.permute.xlu1 %1989  ;;  %v2293_v47 = vcombine.high %v2271_v26, %v2271_v26  ;;  %v2295_v51 = vcombine.high %v2285_v21, %v2285_v21  ;;  %v1521_v20 = vcombine.high %v1499_v16, %v1499_v16  ;;  %v2278_v58 = vrot.slane %v2262_v27, %v4472_v35 }
 0x64b   : > { %v2107_v1 = vmul.f32 %v2085_v60, %v1997_v11  ;;  %v2106_v2 = vmul.f32 %v2081_v48, %v1990_v54  ;;  %v2264_v48 = vcombine.high %v2262_v27, %v2262_v27  ;;  %v1492_v60 = vcombine.high %v1490_v8, %v1490_v8 }
 0x64c   : > { %v1523_v54 = vcombine.high %v1513_v44, %v1513_v44  ;;  %v1506_v21 = vrot.slane %v1490_v8, %v4472_v35  ;;  %v2316_v8 = vrot.slane %v2278_v58, %v4420_v6 }
 0x64d   : > { %v4783_v36 = vadd.f32 %v2107_v1, %v1880_v62  ;;  %v4785_v3 = vadd.f32 %v2106_v2, %v1879_v0  ;;  %v2292_v57 = vrot.slane %v2264_v48, %v4472_v35  ;;  %v2312_v1 = vrot.slane %v2295_v51, %v4420_v6 }
 0x64e   : > { %v2011_v38 = vpop.permute.xlu0 %2010  ;;  %v2004_v33 = vpop.permute.xlu1 %2003  ;;  %v2308_v2 = vrot.slane %v2293_v47, %v4420_v6  ;;  %v1520_v25 = vrot.slane %v1492_v60, %v4472_v35  ;;  %v1522_v51 = vcombine.high %v1506_v21, %v1506_v21 }
 0x64f   : > { %v2109_v4 = vmul.f32 %v2093_v63, %v2011_v38  ;;  %v2108_v43 = vmul.f32 %v2089_v13, %v2004_v33  ;;  %v1532_v13 = vrot.slane %v1513_v44, %v4420_v6  ;;  %v1528_v38 = vrot.slane %v1499_v16, %v4420_v6 }
 0x651   : > { %v2117_v50 = vadd.f32 %v2109_v4, %v1882_v42  ;;  %v2116_v49 = vadd.f32 %v2108_v43, %v1881_v31  ;;  %v2296_v42 = vcombine.high %v2292_v57, %v2292_v57  ;;  %v2294_v31 = vcombine.high %v2278_v58, %v2278_v58 }
 0x652   : > { %v2204_v61 = vpop.permute.xlu0 %2203  ;;  %v2197_v10 = vpop.permute.xlu1 %2196 }
 0x653   : > { %v2338_v11 = vmul.f32 %v2304_v59, %v2204_v61  ;;  %v2337_v17 = vmul.f32 %v2300_v46, %v2197_v10  ;;  %v2320_v46 = vrot.slane %v2292_v57, %v4420_v6  ;;  %v1524_v59 = vcombine.high %v1520_v25, %v1520_v25 }
 0x655   : > { %v2346_v62 = vadd.f32 %v2338_v11, %v4762_v32  ;;  %v2345_v0 = vadd.f32 %v2337_v17, %v4764_v34  ;;  %v1540_v32 = vrot.slane %v1523_v54, %v4420_v6  ;;  %v1536_v34 = vrot.slane %v1521_v20, %v4420_v6 }
 0x656   : > { %v2218_v26 = vpop.permute.xlu0 %2217  ;;  %v2211_v63 = vpop.permute.xlu1 %2210  ;;  %v1566_v17 = vmul.f32 %v1532_v13, %v4728_v28  ;;  %v2324_v54 = vrot.slane %v2294_v31, %v4420_v6  ;;  %v1544_v13 = vrot.slane %v1506_v21, %v4420_v6 }
 0x657   : > { %v2340_v33 = vmul.f32 %v2312_v1, %v2218_v26  ;;  %v2339_v27 = vmul.f32 %v2308_v2, %v2211_v63  ;;  %v1568_v47 = vmul.f32 %v1540_v32, %v4736_v40  ;;  %v1567_v44 = vmul.f32 %v1536_v34, %v4738_v41 }
 0x658   : > { %v1548_v63 = vrot.slane %v1520_v25, %v4420_v6 }
 0x659   : > { %v2348_v4 = vadd.f32 %v2340_v33, %v2113_v52  ;;  %v2347_v43 = vadd.f32 %v2339_v27, %v2112_v53  ;;  %v1565_v52 = vmul.f32 %v1528_v38, %v4730_v30  ;;  %v2328_v53 = vrot.slane %v2296_v42, %v4420_v6 }
 0x65a   : > { %v2232_v48 = vpop.permute.xlu0 %2231  ;;  %v2225_v16 = vpop.permute.xlu1 %2224  ;;  %v1581_v58 = vcombine.low %v1566_v17, %v1568_v47  ;;  %v1556_v27 = vrot.slane %v1524_v59, %v4420_v6  ;;  %v1570_v34 = vmul.f32 %v1548_v63, %v4744_v45  ;;  %v1569_v42 = vmul.f32 %v1544_v13, %v4746_v24 }
 0x65b   : > { %v2361_v60 = vcombine.low %v2346_v62, %v2348_v4  ;;  %v2353_v61 = vcombine.low %v2345_v0, %v2347_v43  ;;  %v2342_v10 = vmul.f32 %v2320_v46, %v2232_v48  ;;  %v2341_v11 = vmul.f32 %v2316_v8, %v2225_v16 }
 0x65c   : > { %v1573_v62 = vcombine.low %v1565_v52, %v1567_v44 }
 0x65d   : > { %v2368_v40 = vrot.slane %v2361_v60, %v4488_v12  ;;  %v2360_v41 = vrot.slane %v2353_v61, %v4488_v12  ;;  %v2350_v20 = vadd.f32 %v2342_v10, %v4783_v36  ;;  %v2349_v57 = vadd.f32 %v2341_v11, %v4785_v3 }
 0x65e   : > { %v2246_v0 = vpop.permute.xlu0 %2245  ;;  %v2239_v1 = vpop.permute.xlu1 %2238  ;;  %v1552_v36 = vrot.slane %v1522_v51, %v4420_v6  ;;  %v1588_v3 = vrot.slane %v1581_v58, %v4488_v12  ;;  %v1580_v32 = vrot.slane %v1573_v62, %v4488_v12 }
 0x65f   : > { %v2344_v2 = vmul.f32 %v2328_v53, %v2246_v0  ;;  %v2343_v28 = vmul.f32 %v2324_v54, %v2239_v1  ;;  %v2385_v26 = vcombine.low %v2360_v41, %v2368_v40  ;;  %v2386_v30 = vcombine.high %v2360_v41, %v2368_v40 }
 0x660   : > { %v1605_v44 = vcombine.low %v1580_v32, %v1588_v3  ;;  %v1606_v48 = vcombine.high %v1580_v32, %v1588_v3  ;;  %v1248_v3 = vld [vmem:[%s5267_s11] sm:$0xff] }
 0x661   : > { %v2352_v38 = vadd.f32 %v2344_v2, %v2117_v50  ;;  %v2351_v33 = vadd.f32 %v2343_v28, %v2116_v49  ;;  %v2393_v51 = vrot.slane %v2385_v26, %v4499_v37  ;;  %v2400_v60 = vrot.slane %v2386_v30, %v4499_v37 }
 0x662   : > { %v1474_v31 = vpop.permute.xlu0 %1473  ;;  %v1467_v4 = vpop.permute.xlu1 %1466  ;;  %v1620_v52 = vrot.slane %v1606_v48, %v4499_v37  ;;  %v1613_v53 = vrot.slane %v1605_v44, %v4499_v37 }
 0x663   : > { %v2377_v43 = vcombine.low %v2350_v20, %v2352_v38  ;;  %v2369_v25 = vcombine.low %v2349_v57, %v2351_v33  ;;  %v1572_v46 = vmul.f32 %v1556_v27, %v1474_v31  ;;  %v1571_v21 = vmul.f32 %v1552_v36, %v1467_v4  ;;  %v1252_v33 = vld [vmem:[%s5267_s11 + $0x20] sm:$0xff]  ;;  %v1251_v27 = vld [vmem:[%s5267_s11 + $0x18] sm:$0xff]  ;;  %v1249_v36 = vld [vmem:[%s5267_s11 + $0x8] sm:$0xff] }
 0x664   : > { %4190 = vmatpush3.msra.mxu1 %v1252_v33 }
 0x665   : > { %v2384_v50 = vrot.slane %v2377_v43, %v4488_v12  ;;  %v2376_v49 = vrot.slane %v2369_v25, %v4488_v12  ;;  %v1597_v8 = vcombine.low %v1570_v34, %v1572_v46  ;;  %v1589_v47 = vcombine.low %v1569_v42, %v1571_v21  ;;  %4191 = vmatprep.subr.mxu1 %v5272_v5 }
 0x666   : > { %4192 = vmatpush3.msra.mxu1 %v1251_v27 }
 0x667   : > { %v1604_v16 = vrot.slane %v1597_v8, %v4488_v12  ;;  %v1596_v45 = vrot.slane %v1589_v47, %v4488_v12  ;;  %v2401_v59 = vcombine.low %v2376_v49, %v2384_v50  ;;  %v2402_v24 = vcombine.high %v2376_v49, %v2384_v50  ;;  %4193 = vmatprep.subr.mxu1 %v5272_v5 }
 0x669   : > { %v1621_v61 = vcombine.low %v1596_v45, %v1604_v16  ;;  %v1622_v10 = vcombine.high %v1596_v45, %v1604_v16  ;;  %v2409_v11 = vrot.slane %v2401_v59, %v4499_v37  ;;  %v2416_v17 = vrot.slane %v2402_v24, %v4499_v37 }
 0x66b   : > { %v1636_v54 = vrot.slane %v1622_v10, %v4499_v37  ;;  %v1629_v40 = vrot.slane %v1621_v61, %v4499_v37  ;;  %v2418_v41 = vcombine.high %v2393_v51, %v2409_v11  ;;  %v2420_v20 = vcombine.high %v2400_v60, %v2416_v17 }
 0x66c   : > { %v2419_v57 = vcombine.low %v2400_v60, %v2416_v17  ;;  %v2417_v58 = vcombine.low %v2393_v51, %v2409_v11 }
 0x66d   : > { %v1639_v62 = vcombine.low %v1620_v52, %v1636_v54  ;;  %v1638_v0 = vcombine.high %v1613_v53, %v1629_v40  ;;  %v1637_v1 = vcombine.low %v1613_v53, %v1629_v40  ;;  %v1640_v2 = vcombine.high %v1620_v52, %v1636_v54 }
 0x66f   : > { %1646 = vrot.lane.b32.xlu0 %v1639_v62, %s4315_s16  ;;  %1642 = vrot.lane.b32.xlu1 %v1638_v0, %s4316_s17 }
 0x673   : > { %1650 = vrot.lane.b32.xlu0 %v1640_v2, %s4317_s18  ;;  %2422 = vrot.lane.b32.xlu1 %v2418_v41, %s4316_s17 }
 0x677   : > { %2430 = vrot.lane.b32.xlu0 %v2420_v20, %s4317_s18  ;;  %2426 = vrot.lane.b32.xlu1 %v2419_v57, %s4315_s16 }
 0x67b   : > { %2436 = vrot.lane.b32.xlu1 %v4624_v55, %s4316_s17  ;;  %v1250_v55 = vld [vmem:[%s5267_s11 + $0x10] sm:$0xff] }
 0x67c   : > { %4194 = vmatpush3.msra.mxu1 %v1250_v55 }
 0x67d   : > { %4195 = vmatprep.subr.mxu1 %v5272_v5 }
 0x67e   : > { %v4848_v28 = vpop.f32.mrf.mxu0  ;;  %4196 = vmatpush3.msra.mxu1 %v1249_v36 }
 0x67f   : > { %5284 = vst [vmem:[#allocation6_spill] sm:$0xff] %v4848_v28  ;;  %4197 = vmatprep.subr.mxu1 %v5272_v5  ;;  %v2680_v54 = vrot.slane %v4848_v28, %v4420_v6  ;;  %v2694_v41 = vrot.slane %v4848_v28, %v4436_v14  ;;  %v2687_v20 = vrot.slane %v4848_v28, %v4431_v7 }
 0x680   : > { %v4211_v26 = vpop.f32.mrf.mxu0  ;;  %4198 = vmatpush3.msra.mxu1 %v1248_v3  ;;  %v2708_v57 = vrot.slane %v4848_v28, %v4444_v18  ;;  %v2715_v62 = vrot.slane %v4848_v28, %v4447_v19 }
 0x681   : > { %4217 = vmatprep.subr.mxu1 %v5272_v5 }
 0x682   : > { %v4850_v30 = vpop.f32.mrf.mxu0 }
 0x683   : > { %v2987_v49 = vrot.slane %v4850_v30, %v4420_v6  ;;  %v3001_v44 = vrot.slane %v4850_v30, %v4436_v14  ;;  %v2994_v48 = vrot.slane %v4850_v30, %v4431_v7  ;;  %v3015_v16 = vrot.slane %v4850_v30, %v4444_v18 }
 0x684   : > { %v4216_v63 = vpop.f32.mrf.mxu0  ;;  %v3008_v45 = vrot.slane %v4850_v30, %v4439_v15  ;;  %v3029_v59 = vrot.slane %v4850_v30, %v4452_v22  ;;  %v3022_v24 = vrot.slane %v4850_v30, %v4447_v19  ;;  %v3036_v60 = vrot.slane %v4850_v30, %v4455_v23 }
 0x686   : > { %v4852_v13 = vpop.f32.mrf.mxu0 }
 0x687   : > { %v3443_v51 = vrot.slane %v4852_v13, %v4420_v6  ;;  %v3457_v61 = vrot.slane %v4852_v13, %v4436_v14  ;;  %v3450_v10 = vrot.slane %v4852_v13, %v4431_v7  ;;  %v3471_v11 = vrot.slane %v4852_v13, %v4444_v18 }
 0x688   : > { %v4226_v38 = vpop.f32.mrf.mxu0  ;;  %v3464_v17 = vrot.slane %v4852_v13, %v4439_v15  ;;  %v3485_v52 = vrot.slane %v4852_v13, %v4452_v22  ;;  %v3478_v53 = vrot.slane %v4852_v13, %v4447_v19  ;;  %v3492_v40 = vrot.slane %v4852_v13, %v4455_v23 }
 0x6e1   : > { %v1647_v32 = vpop.permute.xlu0 %1646  ;;  %v1643_v34 = vpop.permute.xlu1 %1642 }
 0x6e2   : > { %v1653_v42 = vsel %vm1160_vm0, %v1637_v1, %v1643_v34 }
 0x6e3   : > { %v1654_v43 = vsel %vm932_vm13, %v1653_v42, %v1647_v32 }
 0x6e5   : > { %v1651_v31 = vpop.permute.xlu0 %1650  ;;  %v2423_v4 = vpop.permute.xlu1 %2422 }
 0x6e6   : > { %v1655_v25 = vsel %vm1008_vm14, %v1654_v43, %v1651_v31  ;;  %v2433_v46 = vsel %vm1160_vm0, %v2417_v58, %v2423_v4  ;;  %v2701_v58 = vrot.slane %v4848_v28, %v4439_v15 }
 0x6e7   : > { %2440 = vrot.lane.b32.xlu0 %v1655_v25, %s4315_s16 }
 0x6e9   : > { %v2431_v21 = vpop.permute.xlu0 %2430  ;;  %v2427_v50 = vpop.permute.xlu1 %2426 }
 0x6ea   : > { %v2434_v8 = vsel %vm932_vm13, %v2433_v46, %v2427_v50 }
 0x6eb   : > { %2989 = vbcast.lane.b32.xlu0 %v2987_v49, 256  ;;  %v2435_v47 = vsel %vm1008_vm14, %v2434_v8, %v2431_v21 }
 0x6ec   : > { %2444 = vrot.lane.b32.xlu1 %v2435_v47, %s4318_s30 }
 0x6ed   : > { %v2437_v0 = vpop.permute.xlu1 %2436 }
 0x6ee   : > { %v2447_v2 = vsel %vm1160_vm0, %v4583_v9, %v2437_v0 }
 0x6ef   : > { %3003 = vbcast.lane.b32.xlu0 %v3001_v44, 256 }
 0x6f0   : > { %2996 = vbcast.lane.b32.xlu1 %v2994_v48, 256  ;;  %v3041_v48 = vcombine.high %v4850_v30, %v4850_v30 }
 0x6f3   : > { %3017 = vbcast.lane.b32.xlu0 %v3015_v16, 256 }
 0x6f4   : > { %3010 = vbcast.lane.b32.xlu1 %v3008_v45, 256  ;;  %v2741_v45 = vrot.slane %v4848_v28, %v4472_v35 }
 0x6f7   : > { %3031 = vbcast.lane.b32.xlu0 %v3029_v59, 256 }
 0x6f8   : > { %3024 = vbcast.lane.b32.xlu1 %v3022_v24, 256  ;;  %v3048_v24 = vrot.slane %v4850_v30, %v4472_v35 }
 0x6fb   : > { %3445 = vbcast.lane.b32.xlu0 %v3443_v51, 256  ;;  %v2734_v51 = vcombine.high %v4848_v28, %v4848_v28 }
 0x6fc   : > { %3038 = vbcast.lane.b32.xlu1 %v3036_v60, 256  ;;  %v3055_v60 = vrot.slane %v3041_v48, %v4472_v35 }
 0x6fe   : > { %v5027_v0 = vrot.slane %v3055_v60, %v4472_v35 }
 0x6ff   : > { %3459 = vbcast.lane.b32.xlu0 %v3457_v61, 256  ;;  %v3504_v61 = vrot.slane %v4852_v13, %v4472_v35 }
 0x700   : > { %3452 = vbcast.lane.b32.xlu1 %v3450_v10, 256  ;;  %v3497_v10 = vcombine.high %v4852_v13, %v4852_v13 }
 0x703   : > { %3473 = vbcast.lane.b32.xlu0 %v3471_v11, 256  ;;  %v5009_v11 = vrot.slane %v2741_v45, %v4472_v35 }
 0x704   : > { %3466 = vbcast.lane.b32.xlu1 %v3464_v17, 256  ;;  %v2749_v17 = vcombine.high %v2741_v45, %v2741_v45 }
 0x705   : > { %v2779_v13 = vcombine.high %v5009_v11, %v5009_v11 }
 0x707   : > { %3487 = vbcast.lane.b32.xlu0 %v3485_v52, 256  ;;  %v3056_v52 = vcombine.high %v3048_v24, %v3048_v24 }
 0x708   : > { %3480 = vbcast.lane.b32.xlu1 %v3478_v53, 256  ;;  %v5012_v53 = vrot.slane %v3048_v24, %v4472_v35 }
 0x70a   : > { %v3093_v45 = vrot.slane %v5012_v53, %v4420_v6 }
 0x70b   : > { %2682 = vbcast.lane.b32.xlu0 %v2680_v54, 256 }
 0x70c   : > { %3494 = vbcast.lane.b32.xlu1 %v3492_v40, 256  ;;  %v2748_v40 = vrot.slane %v2734_v51, %v4472_v35 }
 0x70f   : > { %2696 = vbcast.lane.b32.xlu0 %v2694_v41, 256  ;;  %v3057_v41 = vcombine.high %v3055_v60, %v3055_v60 }
 0x710   : > { %2689 = vbcast.lane.b32.xlu1 %v2687_v20, 256  ;;  %v3512_v20 = vcombine.high %v3504_v61, %v3504_v61 }
 0x713   : > { %2710 = vbcast.lane.b32.xlu0 %v2708_v57, 256  ;;  %v3511_v57 = vrot.slane %v3497_v10, %v4472_v35  ;;  %v3109_v10 = vrot.slane %v5027_v0, %v4420_v6 }
 0x714   : > { %2703 = vbcast.lane.b32.xlu1 %v2701_v58, 256  ;;  %v5023_v58 = vrot.slane %v2749_v17, %v4472_v35 }
 0x718   : > { %2717 = vbcast.lane.b32.xlu1 %v2715_v62, 256  ;;  %v3078_v62 = vrot.slane %v3056_v52, %v4472_v35 }
 0x759   : > { %v2441_v1 = vpop.permute.xlu0 %2440 }
 0x75a   : > { %v2448_v26 = vsel %vm932_vm13, %v2447_v2, %v2441_v1  ;;  %v3086_v2 = vcombine.high %v5012_v53, %v5012_v53 }
 0x75c   : > { %v3101_v24 = vrot.slane %v3086_v2, %v4420_v6 }
 0x75e   : > { %v2445_v63 = vpop.permute.xlu1 %2444 }
 0x75f   : > { %v2450_v38 = vsel %vm2449_vm5, %v2448_v26, %v2445_v63  ;;  %v3520_v26 = vrot.slane %v3504_v61, %v4472_v35  ;;  %v5035_v63 = vrot.slane %v2748_v40, %v4472_v35  ;;  %v3097_v61 = vrot.slane %v3078_v62, %v4420_v6 }
 0x760   : > { %4200 = vmatmul.mubr.msk.f32.vlgmr.msra.gmra.mxu1 %vm2451_vm6, %v2450_v38  ;;  %v5038_v38 = vrot.slane %v3057_v41, %v4472_v35 }
 0x761   : > { %4218 = vmatpush3.msra.mxu1 %v4644_v39  ;;  %4219 = vmatprep.mubr.msk.f32.mxu1 %vm4311_vm3, %v5272_v5  ;;  %5287 = vst [vmem:[#allocation9_spill] sm:$0xff] %v5035_v63  ;;  %v3542_v51 = vcombine.high %v3520_v26, %v3520_v26  ;;  %v2780_v60 = vcombine.high %v5035_v63, %v5035_v63 }
 0x762   : > { %4227 = vmatprep.subr.mxu1 %v5272_v5  ;;  %v3089_v17 = vcombine.high %v5038_v38, %v5038_v38 }
 0x763   : > { %v3557_v2 = vrot.slane %v3542_v51, %v4420_v6 }
 0x764   : > { %4220 = vmatmul.mubr.msk.f32.vlgmr.msra.gmra.mxu1 %vm932_vm13, %v4598_v56 }
 0x765   : > { %4237 = vmatprep.mubr.msk.f32.mxu1 %vm4311_vm3, %v5272_v5 }
 0x820   : > { %v4939_v9 = vpop.f32.mrf.mxu1 }
 0x821   : > { %5285 = vst [vmem:[#allocation7_spill] sm:$0xff] %v4939_v9 }
 0x822   : > { %v4201_v33 = vpop.f32.mrf.mxu1 }
 0x823   : > { %v3534_v33 = vrot.slane %v3512_v20, %v4472_v35 }
 0x824   : > { %v4941_v27 = vpop.f32.mrf.mxu1 }
 0x825   : > { %v3218_v55 = vrot.slane %v4941_v27, %v4431_v7  ;;  %v3211_v36 = vrot.slane %v4941_v27, %v4420_v6  ;;  %v3232_v56 = vrot.slane %v4941_v27, %v4439_v15  ;;  %v3225_v32 = vrot.slane %v4941_v27, %v4436_v14 }
 0x826   : > { %v4221_v3 = vpop.f32.mrf.mxu1  ;;  %v3246_v34 = vrot.slane %v4941_v27, %v4447_v19  ;;  %v3239_v7 = vrot.slane %v4941_v27, %v4444_v18  ;;  %v3260_v42 = vrot.slane %v4941_v27, %v4455_v23  ;;  %v3253_v31 = vrot.slane %v4941_v27, %v4452_v22  ;;  %v4963_v19 = vpop.permute.xlu0 %2989 }
 0x827   : > { %3220 = vbcast.lane.b32.xlu1 %v3218_v55, 256  ;;  %3213 = vbcast.lane.b32.xlu0 %v3211_v36, 256  ;;  %v2729_v14 = vrot.slane %v4848_v28, %v4455_v23  ;;  %v2722_v15 = vrot.slane %v4848_v28, %v4452_v22  ;;  %v4965_v18 = vpop.permute.xlu1 %2996  ;;  %v3272_v1 = vrot.slane %v4941_v27, %v4472_v35 }
 0x828   : > { %v2750_v36 = vcombine.high %v2748_v40, %v2748_v40  ;;  %v5044_v3 = vrot.slane %v3511_v57, %v4472_v35  ;;  %v3265_v48 = vcombine.high %v4941_v27, %v4941_v27  ;;  %v3544_v52 = vcombine.high %v3534_v33, %v3534_v33 }
 0x829   : > { %v3549_v27 = vrot.slane %v3520_v26, %v4420_v6  ;;  %v3288_v41 = vrot.slane %v3272_v1, %v4472_v35  ;;  %v3130_v28 = vmul.f32 %v3093_v45, %v4963_v19  ;;  %v3131_v37 = vmul.f32 %v3097_v61, %v4965_v18 }
 0x82a   : > { %v4967_v4 = vpop.permute.xlu0 %3003  ;;  %v3543_v53 = vcombine.high %v5044_v3, %v5044_v3 }
 0x82b   : > { %3234 = vbcast.lane.b32.xlu1 %v3232_v56, 256  ;;  %3227 = vbcast.lane.b32.xlu0 %v3225_v32, 256  ;;  %v4969_v43 = vpop.permute.xlu1 %3010  ;;  %v3513_v56 = vcombine.high %v3511_v57, %v3511_v57  ;;  %v5047_v32 = vrot.slane %v2779_v13, %v4420_v6  ;;  %v3317_v55 = vrot.slane %v3288_v41, %v4420_v6 }
 0x82c   : > { %v5102_v51 = vrot.slane %v3543_v53, %v4420_v6  ;;  %v3132_v19 = vmul.f32 %v3101_v24, %v4967_v4 }
 0x82d   : > { %v5073_v40 = vrot.slane %v3513_v56, %v4472_v35  ;;  %v2781_v56 = vcombine.high %v5023_v58, %v5023_v58 }
 0x82e   : > { %v4971_v25 = vpop.permute.xlu0 %3017 }
 0x82f   : > { %3248 = vbcast.lane.b32.xlu1 %v3246_v34, 256  ;;  %3241 = vbcast.lane.b32.xlu0 %v3239_v7, 256  ;;  %v4973_v46 = vpop.permute.xlu1 %3024  ;;  %v3569_v5 = vrot.slane %v5073_v40, %v4420_v6 }
 0x832   : > { %v4975_v21 = vpop.permute.xlu0 %3031 }
 0x833   : > { %3262 = vbcast.lane.b32.xlu1 %v3260_v42, 256  ;;  %3255 = vbcast.lane.b32.xlu0 %v3253_v31, 256  ;;  %v4977_v23 = vpop.permute.xlu1 %3038  ;;  %v3088_v31 = vcombine.high %v3078_v62, %v3078_v62  ;;  %v3279_v62 = vrot.slane %v3265_v48, %v4472_v35  ;;  %v3561_v48 = vrot.slane %v3544_v52, %v4420_v6 }
 0x834   : > { %v2798_v52 = vrot.slane %v2781_v56, %v4420_v6 }
 0x835   : > { %v3105_v20 = vrot.slane %v3088_v31, %v4420_v6  ;;  %v3281_v7 = vcombine.high %v3279_v62, %v3279_v62  ;;  %v3295_v63 = vrot.slane %v3279_v62, %v4472_v35 }
 0x836   : > { %v4979_v50 = vpop.permute.xlu0 %3445 }
 0x837   : > { %2731 = vbcast.lane.b32.xlu1 %v2729_v14, 256  ;;  %2724 = vbcast.lane.b32.xlu0 %v2722_v15, 256  ;;  %v4981_v22 = vpop.permute.xlu1 %3452  ;;  %v3087_v14 = vcombine.high %v5027_v0, %v5027_v0  ;;  %v3280_v15 = vcombine.high %v3272_v1, %v3272_v1  ;;  %v3113_v0 = vrot.slane %v5038_v38, %v4420_v6 }
 0x838   : > { %v5090_v1 = vrot.slane %v2750_v36, %v4472_v35  ;;  %v3565_v38 = vrot.slane %v5044_v3, %v4420_v6  ;;  %v3310_v36 = vcombine.high %v3288_v41, %v3288_v41  ;;  %v3545_v3 = vcombine.high %v5073_v40, %v5073_v40 }
 0x839   : > { %v5078_v57 = vrot.slane %v3087_v14, %v4420_v6  ;;  %v3302_v13 = vrot.slane %v3280_v15, %v4472_v35  ;;  %v5095_v14 = vrot.slane %v3089_v17, %v4420_v6  ;;  %v3553_v15 = vrot.slane %v3534_v33, %v4420_v6 }
 0x83a   : > { %v4983_v49 = vpop.permute.xlu0 %3459  ;;  %5289 = vst [vmem:[#allocation11_spill] sm:$0xff] %v5090_v1  ;;  %v2782_v39 = vcombine.high %v5090_v1, %v5090_v1  ;;  %v3325_v56 = vrot.slane %v3310_v36, %v4420_v6  ;;  %v3309_v1 = vrot.slane %v3281_v7, %v4472_v35  ;;  %v3133_v18 = vmul.f32 %v3105_v20, %v4969_v43 }
 0x83b   : > { %v4985_v8 = vpop.permute.xlu1 %3466  ;;  %v3321_v17 = vrot.slane %v3302_v13, %v4420_v6  ;;  %v3312_v33 = vcombine.high %v3302_v13, %v3302_v13  ;;  %v3587_v40 = vmul.f32 %v3553_v15, %v4981_v22  ;;  %v2810_v22 = vrot.slane %v2780_v60, %v4420_v6 }
 0x83c   : > { %v3589_v35 = vmul.f32 %v3561_v48, %v4985_v8  ;;  %v2814_v4 = vrot.slane %v2782_v39, %v4420_v6  ;;  %v3337_v24 = vrot.slane %v3309_v1, %v4420_v6  ;;  %v3333_v20 = vrot.slane %v3295_v63, %v4420_v6 }
 0x83d   : > { %v3135_v60 = vmul.f32 %v3113_v0, %v4973_v46  ;;  %v5291_v46 = vrot.slane %v5023_v58, %v4420_v6 }
 0x83e   : > { %v4987_v47 = vpop.permute.xlu0 %3473 }
 0x83f   : > { %v4989_v44 = vpop.permute.xlu1 %3480  ;;  %v3590_v39 = vmul.f32 %v3565_v38, %v4987_v47 }
 0x840   : > { %v3591_v15 = vmul.f32 %v3569_v5, %v4989_v44 }
 0x842   : > { %v4993_v16 = vpop.permute.xlu0 %3487 }
 0x843   : > { %v4997_v59 = vpop.permute.xlu1 %3494 }
 0x844   : > { %5286 = vst [vmem:[#allocation8_spill] sm:$0xff] %v4997_v59  ;;  %v3329_v59 = vrot.slane %v3312_v33, %v4420_v6 }
 0x846   : > { %v5014_v30 = vpop.permute.xlu0 %2682 }
 0x847   : > { %v5016_v54 = vpop.permute.xlu1 %2689 }
 0x84a   : > { %v5049_v34 = vpop.permute.xlu0 %2696 }
 0x84b   : > { %v5053_v42 = vpop.permute.xlu1 %2703  ;;  %v2825_v48 = vmul.f32 %v5047_v32, %v5049_v34 }
 0x84c   : > { %v2826_v62 = vmul.f32 %v2798_v52, %v5053_v42  ;;  %v2824_v42 = vmul.f32 %v5291_v46, %v5016_v54  ;;  %v3136_v52 = vmul.f32 %v5078_v57, %v4975_v21 }
 0x84e   : > { %v5085_v26 = vpop.permute.xlu0 %2710  ;;  %v2839_v47 = vcombine.low %v2824_v42, %v2826_v62 }
 0x84f   : > { %5288 = vst [vmem:[#allocation10_spill] sm:$0xff] %v5085_v26  ;;  %v5092_v31 = vpop.permute.xlu1 %2717 }
 0x850   : > { %5290 = vst [vmem:[#allocation12_spill] sm:$0xff] %v5092_v31  ;;  %v3586_v31 = vmul.f32 %v3549_v27, %v4979_v50 }
 0x899   : > { %v3221_v29 = vpop.permute.xlu1 %3220  ;;  %v3214_v9 = vpop.permute.xlu0 %3213 }
 0x89a   : > { %v3355_v41 = vmul.f32 %v3321_v17, %v3221_v29  ;;  %v3354_v13 = vmul.f32 %v3317_v55, %v3214_v9  ;;  %v3577_v29 = vrot.slane %v3545_v3, %v4420_v6  ;;  %v5292_v17 = vrot.slane %v5009_v11, %v4420_v6 }
 0x89b   : > { %v3137_v11 = vmul.f32 %v5095_v14, %v4977_v23  ;;  %v2846_v23 = vrot.slane %v2839_v47, %v4488_v12  ;;  %v5297_v14 = vld [vmem:[#allocation12_spill] sm:$0xff] }
 0x89c   : > { %v3363_v53 = vadd.f32 %v3355_v41, %v3131_v37  ;;  %v3362_v26 = vadd.f32 %v3354_v13, %v3130_v28  ;;  %v3134_v37 = vmul.f32 %v3109_v10, %v4971_v25  ;;  %v3588_v28 = vmul.f32 %v3557_v2, %v4983_v49 }
 0x89d   : > { %v3235_v9 = vpop.permute.xlu1 %3234  ;;  %v3228_v50 = vpop.permute.xlu0 %3227  ;;  %v3311_v25 = vcombine.high %v3295_v63, %v3295_v63  ;;  %v2823_v33 = vmul.f32 %v5292_v17, %v5014_v30  ;;  %v3592_v41 = vmul.f32 %v5102_v51, %v4993_v16 }
 0x89e   : > { %v3595_v55 = vadd.f32 %v3587_v40, %v3363_v53  ;;  %v3594_v45 = vadd.f32 %v3586_v31, %v3362_v26  ;;  %v3357_v61 = vmul.f32 %v3329_v59, %v3235_v9  ;;  %v3356_v27 = vmul.f32 %v3325_v56, %v3228_v50  ;;  %v5294_v9 = vld [vmem:[#allocation10_spill] sm:$0xff]  ;;  %v5295_v50 = vld [vmem:[#allocation9_spill] sm:$0xff] }
 0x89f   : > { %v3313_v31 = vcombine.high %v3309_v1, %v3309_v1  ;;  %v3341_v32 = vrot.slane %v3311_v25, %v4420_v6  ;;  %v2831_v13 = vcombine.low %v2823_v33, %v2825_v48 }
 0x8a0   : > { %v3365_v7 = vadd.f32 %v3357_v61, %v3133_v18  ;;  %v3364_v43 = vadd.f32 %v3356_v27, %v3132_v19  ;;  %v5293_v19 = vld [vmem:[#allocation8_spill] sm:$0xff] }
 0x8a1   : > { %v3249_v59 = vpop.permute.xlu1 %3248  ;;  %v3242_v26 = vpop.permute.xlu0 %3241  ;;  %v3345_v5 = vrot.slane %v3313_v31, %v4420_v6  ;;  %v3593_v18 = vmul.f32 %v3577_v29, %v5293_v19 }
 0x8a2   : > { %v3597_v10 = vadd.f32 %v3589_v35, %v3365_v7  ;;  %v3596_v49 = vadd.f32 %v3588_v28, %v3364_v43  ;;  %v3359_v2 = vmul.f32 %v3337_v24, %v3249_v59  ;;  %v3358_v8 = vmul.f32 %v3333_v20, %v3242_v26 }
 0x8a3   : > { %v2838_v43 = vrot.slane %v2831_v13, %v4488_v12 }
 0x8a4   : > { %v3610_v0 = vcombine.low %v3595_v55, %v3597_v10  ;;  %v3602_v36 = vcombine.low %v3594_v45, %v3596_v49  ;;  %v3367_v1 = vadd.f32 %v3359_v2, %v3135_v60  ;;  %v3366_v63 = vadd.f32 %v3358_v8, %v3134_v37  ;;  %v5298_v37 = vld [vmem:[#allocation11_spill] sm:$0xff]  ;;  %v5300_v8 = vld [vmem:[#allocation4_spill] sm:$0xff] }
 0x8a5   : > { %v3263_v44 = vpop.permute.xlu1 %3262  ;;  %v3256_v34 = vpop.permute.xlu0 %3255  ;;  %v5296_v55 = vrot.slane %v5295_v50, %v4420_v6  ;;  %v5299_v16 = vrot.slane %v5298_v37, %v4420_v6  ;;  %v2863_v59 = vcombine.low %v2838_v43, %v2846_v23  ;;  %v2864_v26 = vcombine.high %v2838_v43, %v2846_v23 }
 0x8a6   : > { %v3617_v38 = vrot.slane %v3610_v0, %v4488_v12  ;;  %v3609_v54 = vrot.slane %v3602_v36, %v4488_v12  ;;  %v3599_v58 = vadd.f32 %v3591_v15, %v3367_v1  ;;  %v3598_v3 = vadd.f32 %v3590_v39, %v3366_v63 }
 0x8a7   : > { %v3361_v30 = vmul.f32 %v3345_v5, %v3263_v44  ;;  %v3360_v53 = vmul.f32 %v3341_v32, %v3256_v34  ;;  %v2827_v45 = vmul.f32 %v5296_v55, %v5294_v9  ;;  %v2828_v51 = vmul.f32 %v5299_v16, %v5297_v14  ;;  %v1257_v32 = vld [vmem:[%s5267_s11 + $0x48] sm:$0xff]  ;;  %v1256_v34 = vld [vmem:[%s5267_s11 + $0x40] sm:$0xff] }
 0x8a8   : > { %v3634_v40 = vcombine.low %v3609_v54, %v3617_v38  ;;  %v3635_v56 = vcombine.high %v3609_v54, %v3617_v38  ;;  %v2878_v39 = vrot.slane %v2864_v26, %v5300_v8  ;;  %v2871_v48 = vrot.slane %v2863_v59, %v5300_v8  ;;  %4228 = vmatpush3.msra.mxu1 %v1257_v32  ;;  %v4089_v26 = vld [vmem:[#allocation2] ss:$0 sm:$0xff] }
 0x8a9   : > { %v3369_v61 = vadd.f32 %v3361_v30, %v3137_v11  ;;  %v3368_v21 = vadd.f32 %v3360_v53, %v3136_v52  ;;  %v2732_v57 = vpop.permute.xlu1 %2731  ;;  %v2725_v27 = vpop.permute.xlu0 %2724  ;;  %v5301_v54 = vmov 0.0   ;;  %v1254_v52 = vld [vmem:[%s5267_s11 + $0x30] sm:$0xff]  ;;  %v1253_v11 = vld [vmem:[%s5267_s11 + $0x28] sm:$0xff]  ;;  %v3779_v30 = vld [vmem:[%s5269_s13 + $0x18] sm:$0xff] }
 0x8aa   : > { %v2830_v28 = vmul.f32 %v2814_v4, %v2732_v57  ;;  %v2829_v35 = vmul.f32 %v2810_v22, %v2725_v27  ;;  %v3642_v42 = vrot.slane %v3634_v40, %v5300_v8  ;;  %v3649_v36 = vrot.slane %v3635_v56, %v5300_v8  ;;  %4229 = vmatprep.subr.mxu1 %v5301_v54  ;;  %v5303_v27 = vld [vmem:[#allocation5_spill] sm:$0xff] }
 0x8ab   : > { %v3601_v7 = vadd.f32 %v3593_v18, %v3369_v61  ;;  %v3600_v29 = vadd.f32 %v3592_v41, %v3368_v21  ;;  %4230 = vmatpush3.msra.mxu1 %v1256_v34  ;;  %4241 = vmatpush3.msra.mxu0 %v3779_v30 }
 0x8ac   : > { %v2855_v24 = vcombine.low %v2828_v51, %v2830_v28  ;;  %v2847_v20 = vcombine.low %v2827_v45, %v2829_v35  ;;  %4231 = vmatprep.subr.mxu1 %v5301_v54  ;;  %4242 = vmatprep.subr.mxu0 %v5301_v54  ;;  %v3778_v51 = vld [vmem:[%s5269_s13 + $0x10] sm:$0xff]  ;;  %v3777_v28 = vld [vmem:[%s5269_s13 + $0x8] sm:$0xff]  ;;  %v3776_v35 = vld [vmem:[%s5269_s13] sm:$0xff] }
 0x8ad   : > { %v3626_v60 = vcombine.low %v3599_v58, %v3601_v7  ;;  %v3618_v62 = vcombine.low %v3598_v3, %v3600_v29  ;;  %v5302_v58 = vld [vmem:[#allocation6_spill] sm:$0xff]  ;;  %4243 = vmatpush3.msra.mxu0 %v3778_v51  ;;  %v5304_v29 = vld [vmem:[#allocation7_spill] sm:$0xff] }
 0x8ae   : > { %v2862_v31 = vrot.slane %v2855_v24, %v4488_v12  ;;  %v2854_v25 = vrot.slane %v2847_v20, %v4488_v12  ;;  %v1255_v3 = vld [vmem:[%s5267_s11 + $0x38] sm:$0xff]  ;;  %4244 = vmatprep.subr.mxu0 %v5301_v54  ;;  %v4073_v7 = vld [vmem:[%s5268_s12] ss:$0 sm:$0xff] }
 0x8af   : > { %v3633_v10 = vrot.slane %v3626_v60, %v4488_v12  ;;  %v3625_v6 = vrot.slane %v3618_v62, %v4488_v12  ;;  %4232 = vmatpush3.msra.mxu1 %v1255_v3  ;;  %4245 = vmatpush3.msra.mxu0 %v3777_v28  ;;  %v2525_v43 = vadd.f32 %v4073_v7, %v5304_v29 }
 0x8b0   : > { %v2879_v4 = vcombine.low %v2854_v25, %v2862_v31  ;;  %v2880_v22 = vcombine.high %v2854_v25, %v2862_v31  ;;  %4233 = vmatprep.subr.mxu1 %v5301_v54  ;;  %4246 = vmatprep.subr.mxu0 %v5301_v54 }
 0x8b1   : > { %v3650_v49 = vcombine.low %v3625_v6, %v3633_v10  ;;  %v3651_v2 = vcombine.high %v3625_v6, %v3633_v10  ;;  %4234 = vmatpush3.msra.mxu1 %v1254_v52  ;;  %4247 = vmatpush3.msra.mxu0 %v3776_v35  ;;  %v5305_v6 = vld [vmem:[#allocation3_spill] sm:$0xff] }
 0x8b2   : > { %v2894_v15 = vrot.slane %v2880_v22, %v5300_v8  ;;  %v2887_v46 = vrot.slane %v2879_v4, %v5300_v8  ;;  %4235 = vmatprep.subr.mxu1 %v5301_v54  ;;  %v3862_v22 = vld [vmem:[%s5263_s7] sm:$0x1] }
 0x8b3   : > { %v3658_v0 = vrot.slane %v3650_v49, %v5300_v8  ;;  %v3665_v12 = vrot.slane %v3651_v2, %v5300_v8  ;;  %4236 = vmatpush3.msra.mxu1 %v1253_v11 }
 0x8b4   : > { %v2897_v1 = vcombine.low %v2878_v39, %v2894_v15  ;;  %v2896_v63 = vcombine.high %v2871_v48, %v2887_v46  ;;  %v2895_v17 = vcombine.low %v2871_v48, %v2887_v46  ;;  %v2898_v38 = vcombine.high %v2878_v39, %v2894_v15  ;;  %4251 = vmatprep.subr.mxu1 %v5301_v54 }
 0x8b5   : > { %v3667_v33 = vcombine.high %v3642_v42, %v3658_v0  ;;  %v3669_v47 = vcombine.high %v3649_v36, %v3665_v12  ;;  %v3668_v5 = vcombine.low %v3649_v36, %v3665_v12  ;;  %v3666_v44 = vcombine.low %v3642_v42, %v3658_v0 }
 0x8b6   : > { %2904 = vrot.lane.b32.xlu1 %v2897_v1, %s4315_s16  ;;  %2900 = vrot.lane.b32.xlu0 %v2896_v63, %s4316_s17 }
 0x8ba   : > { %2908 = vrot.lane.b32.xlu1 %v2898_v38, %s4317_s18  ;;  %3671 = vrot.lane.b32.xlu0 %v3667_v33, %s4316_s17 }
 0x8be   : > { %3679 = vrot.lane.b32.xlu1 %v3669_v47, %s4317_s18  ;;  %3675 = vrot.lane.b32.xlu0 %v3668_v5, %s4315_s16 }
 0x8c2   : > { %3685 = vrot.lane.b32.xlu0 %v5302_v58, %s4316_s17  ;;  %s585_s17 = scalar_lea.vmem %s5271_s15, %s5307_s21 }
 0x928   : > { %v2905_v53 = vpop.permute.xlu1 %2904  ;;  %v2901_v41 = vpop.permute.xlu0 %2900 }
 0x929   : > { %v2911_v13 = vsel %vm1160_vm0, %v2895_v17, %v2901_v41 }
 0x92a   : > { %v2912_v56 = vsel %vm932_vm13, %v2911_v13, %v2905_v53 }
 0x92c   : > { %v2909_v40 = vpop.permute.xlu1 %2908  ;;  %v3672_v19 = vpop.permute.xlu0 %3671 }
 0x92d   : > { %v2913_v18 = vsel %vm1008_vm14, %v2912_v56, %v2909_v40  ;;  %v3682_v9 = vsel %vm1160_vm0, %v3666_v44, %v3672_v19 }
 0x92e   : > { %3689 = vrot.lane.b32.xlu1 %v2913_v18, %s4315_s16 }
 0x930   : > { %v3680_v50 = vpop.permute.xlu1 %3679  ;;  %v3676_v55 = vpop.permute.xlu0 %3675 }
 0x931   : > { %v3683_v45 = vsel %vm932_vm13, %v3682_v9, %v3676_v55 }
 0x932   : > { %v3684_v61 = vsel %vm1008_vm14, %v3683_v45, %v3680_v50 }
 0x933   : > { %3693 = vrot.lane.b32.xlu0 %v3684_v61, %s4318_s30 }
 0x934   : > { %v3686_v21 = vpop.permute.xlu0 %3685 }
 0x935   : > { %v3696_v23 = vsel %vm1160_vm0, %v5303_v27, %v3686_v21 }
 0x9a0   : > { %v3690_v57 = vpop.permute.xlu1 %3689 }
 0x9a1   : > { %v3697_v14 = vsel %vm932_vm13, %v3696_v23, %v3690_v57 }
 0x9a5   : > { %v3694_v37 = vpop.permute.xlu0 %3693 }
 0x9a6   : > { %v3698_v16 = vsel %vm2449_vm5, %v3697_v14, %v3694_v37 }
 0x9a7   : > { %4238 = vmatmul.mubr.msk.f32.vlgmr.msra.gmra.mxu1 %vm2451_vm6, %v3698_v16 }
 0x9a8   : > { %4253 = vmatprep.mubr.msk.f32.mxu1 %vm4311_vm3, %v5301_v54 }
 0xa67   : > { %v3768_v24 = vpop.f32.mrf.mxu1 }
 0xa68   : > { %v3772_v20 = vadd.f32 %v3768_v24, %v2525_v43 }
 0xa69   : > { %v4239_v60 = vpop.f32.mrf.mxu1 }
 0xa6a   : > { %vm3773_vm3 = vcmp.gt.f32.partialorder %v3772_v20, 0.0  ;;  %v3774_v62 = vmul.f32 0.01, %v3772_v20 }
 0xa6c   : > { %v3775_v59 = vsel %vm3773_vm3, %v3772_v20, %v3774_v62 }
 0xa6d   : > { %4249 = vmatmul.mubr.msk.f32.vlgmr.msra.gmra.mxu0 %vm3787_vm7, %v3775_v59 }
 0xb2d   : > { %v3857_v31 = vpop.f32.mrf.mxu0 }
 0xb2e   : > { %v3858_v25 = vadd.f32 %v4089_v26, %v3857_v31 }
 0xb2f   : > { %v4250_v10 = vpop.f32.mrf.mxu0 }
 0xb30   : > { %v3861_v4 = vmul.f32 %v5305_v6, %v3858_v25 }
 0xb32   : > { %4252 = vmatpush3.msra.mxu1 %v3861_v4 }
 0xb33   : > { %4254 = vmatmul.mubr.msk.f32.vlgmr.msra.gmra.mxu1 %vm932_vm13, %v3862_v22 }
 0xbf3   : > { %v3932_v49 = vpop.f32.mrf.mxu1 }
 0xbf4   : > { %3937 = vst.msk [vmem:[%s585_s17] sm:$0x1] %vm3936_vm8, %v3932_v49 }
 0xbf5   : > { %v4255_v2 = vpop.f32.mrf.mxu1 }
 0xbf6 PF: > { %s27_s20 = sadd.s32 1, %s4300_s20  }
 0xbf7   : > { %p24_p4 = scmp.ge.s32.totalorder %s27_s20, 4  }
 0xbf9   :  { %26 = sbr.rel (!%p24_p4) target bundleno = 3 (0x3), region = 129 }

</bundles_post_ra>
